<compile_context>
chip_gen: v7x
topology: tpu7x:2x2x1
jax: 0.10.0
libtpu: 0.0.40
codegen_flags: <defaults>
</compile_context>

<pallas_src>
import jax
import jax.numpy as jnp
from jax import lax
from jax.experimental import pallas as pl
from jax.experimental.pallas import tpu as pltpu

EPSILON = 1e-4  # self.epsilon in PPNet


def _round_up(n, m):
    return ((n + m - 1) // m) * m


def ppnet_kernel(f_ref, w1_ref, b1_ref, w2_ref, b2_ref, proto_ref, wlast_ref,
                 logits_ref, mind_ref):
    f = f_ref[0]                                   # (B_tile*S, C), f32
    b_tile = logits_ref.shape[1]
    rows = f.shape[0]
    s = rows // b_tile                             # pixels per image

    w1 = w1_ref[...]
    w2 = w2_ref[...]
    protos = proto_ref[...]                        # (P_pad, D), f32 (zero-padded)

    # add_on_layers (bottleneck, C == D): Conv1x1 -> ReLU -> Conv1x1 -> Sigmoid.
    # MXU in bf16, accumulate + elementwise in f32.
    z1 = jnp.dot(f.astype(jnp.bfloat16), w1.astype(jnp.bfloat16),
                 preferred_element_type=jnp.float32) + b1_ref[...]
    z1 = jnp.maximum(z1, 0.0)
    z = jnp.dot(z1.astype(jnp.bfloat16), w2.astype(jnp.bfloat16),
                preferred_element_type=jnp.float32) + b2_ref[...]
    z = jax.nn.sigmoid(z)                          # (rows, D), f32

    # _l2_convolution with 1x1 prototypes:
    #   per-pixel ||z||^2 and ||p||^2 in f32 (cancellation-sensitive),
    #   the cross term z.p on the MXU in bf16 with f32 accumulation.
    x2 = jnp.sum(z * z, axis=-1, keepdims=True)                        # (rows, 1)
    p2 = jnp.sum(protos * protos, axis=-1)[None, :]                    # (1, P_pad)
    xp = jnp.dot(z.astype(jnp.bfloat16), protos.astype(jnp.bfloat16).T,
                 preferred_element_type=jnp.float32)                   # (rows, P_pad)
    d = jnp.maximum(x2 - 2.0 * xp + p2, 0.0)                           # (rows, P_pad)

    # min_distances = -maxpool(-d) over the full spatial extent == per-image min.
    min_d = jnp.min(d.reshape(b_tile, s, d.shape[-1]), axis=1)         # (B_tile, P_pad)

    # distance_2_similarity ('log'): log((d+1)/(d+eps)) as a log difference (EUP).
    sim = jnp.log(min_d + 1.0) - jnp.log(min_d + EPSILON)

    # last_layer: Linear(P -> K, bias=False); padded rows of wlast are zero, so
    # the padded prototype columns contribute nothing.  Tiny matmul, keep f32.
    logits = jnp.dot(sim, wlast_ref[...], preferred_element_type=jnp.float32)

    mind_ref[0] = min_d                            # (B_tile, P_pad), lane-dense
    logits_ref[0] = logits                         # (B_tile, K_pad), lane-dense


def ppnet_pallas(f_nsc, w1, b1, w2, b2, protos, wlast_t, *, b_tile=None):
    N, S, C = f_nsc.shape
    D = w1.shape[1]
    P = protos.shape[0]
    K = wlast_t.shape[1]

    if b_tile is None or b_tile > N:
        b_tile = N
    assert N % b_tile == 0, "batch must divide evenly into batch tiles"
    G = N // b_tile

    # Lane-dense output padding (P, K -> multiples of 128).
    P_pad = _round_up(P, 128)
    K_pad = _round_up(K, 128)
    protos_pad = jnp.zeros((P_pad, D), jnp.float32).at[:P, :].set(protos)
    wlast_pad = jnp.zeros((P_pad, K_pad), jnp.float32).at[:P, :K].set(wlast_t)

    # Batch-tiled view: each grid step gets a contiguous (b_tile*S, C) row slab.
    f_tiles = f_nsc.reshape(G, b_tile * S, C)

    logits_pad, mind_pad = pl.pallas_call(
        ppnet_kernel,
        out_shape=(jax.ShapeDtypeStruct((G, b_tile, K_pad), jnp.float32),
                   jax.ShapeDtypeStruct((G, b_tile, P_pad), jnp.float32)),
        grid=(G,),
        in_specs=[
            pl.BlockSpec((1, b_tile * S, C), lambda g: (g, 0, 0)),  # pixel features
            pl.BlockSpec((C, D), lambda g: (0, 0)),                 # add_on conv1 weight
            pl.BlockSpec((1, D), lambda g: (0, 0)),                 # add_on conv1 bias
            pl.BlockSpec((D, D), lambda g: (0, 0)),                 # add_on conv2 weight
            pl.BlockSpec((1, D), lambda g: (0, 0)),                 # add_on conv2 bias
            pl.BlockSpec((P_pad, D), lambda g: (0, 0)),             # prototypes (padded)
            pl.BlockSpec((P_pad, K_pad), lambda g: (0, 0)),         # last-layer W^T (padded)
        ],
        out_specs=(pl.BlockSpec((1, b_tile, K_pad), lambda g: (g, 0, 0)),
                   pl.BlockSpec((1, b_tile, P_pad), lambda g: (g, 0, 0))),
        compiler_params=pltpu.CompilerParams(
            dimension_semantics=("parallel",),
            vmem_limit_bytes=32 * 1024 * 1024),
    )(f_tiles, w1, b1, w2, b2, protos_pad, wlast_pad)

    logits = logits_pad.reshape(N, K_pad)[:, :K]
    min_d = mind_pad.reshape(N, P_pad)[:, :P]
    return logits, min_d


def features_backbone(x_nhwc, conv_w_hwio, conv_b):
    # Stand-in for the injected `features` module (a tiny VGG-like stage):
    # Conv3x3(pad=1) -> ReLU -> MaxPool2x2, run in NHWC so the feature map
    # flows into the kernel with a pure reshape (no transpose).
    y = lax.conv_general_dilated(
        x_nhwc, conv_w_hwio, window_strides=(1, 1), padding=((1, 1), (1, 1)),
        dimension_numbers=('NHWC', 'HWIO', 'NHWC'))
    y = y + conv_b[None, None, None, :]
    y = jnp.maximum(y, 0.0)
    y = lax.reduce_window(y, -jnp.inf, lax.max, (1, 2, 2, 1), (1, 2, 2, 1), 'VALID')
    return y                                              # (N, Hf, Wf, C)


def ppnet_ref(f_nsc, w1, b1, w2, b2, protos, wlast_t):
    # Pure-JAX reference.  It mirrors the kernel's mixed precision (bf16 MXU
    # operands, f32 accumulation and f32 distance assembly) so the comparison
    # checks the PPNet algorithm rather than bf16 rounding.
    bf = lambda a: a.astype(jnp.bfloat16)
    z1 = jnp.maximum(
        jnp.einsum('nsc,cd->nsd', bf(f_nsc), bf(w1),
                   preferred_element_type=jnp.float32) + b1, 0.0)
    z = jax.nn.sigmoid(
        jnp.einsum('nsd,de->nse', bf(z1), bf(w2),
                   preferred_element_type=jnp.float32) + b2)
    x2 = jnp.sum(z * z, axis=-1, keepdims=True)
    p2 = jnp.sum(protos * protos, axis=-1)[None, None, :]
    xp = jnp.einsum('nsd,pd->nsp', bf(z), bf(protos),
                    preferred_element_type=jnp.float32)
    d = jnp.maximum(x2 - 2.0 * xp + p2, 0.0)
    min_d = jnp.min(d, axis=1)
    sim = jnp.log(min_d + 1.0) - jnp.log(min_d + EPSILON)
    return sim @ wlast_t, min_d


if __name__ == "__main__":
    key = jax.random.PRNGKey(0)
    k_x, k_conv, k_w1, k_w2, k_proto, k_last = jax.random.split(key, 6)

    # small, PPNet-consistent shapes
    N, Cin, H, W = 8, 3, 16, 16
    C_feat = 8     # backbone out channels == first_add_on_layer_in_channels
    D = 8          # prototype_shape[1]
    P = 16         # num_prototypes  (prototype_shape = (16, 8, 1, 1))
    K = 4          # num_classes     (4 prototypes per class)
    B_TILE = 4     # 4 images * 64 pixels = 256 MXU rows per grid step; grid=(2,)

    x_nchw = jax.random.normal(k_x, (N, Cin, H, W), jnp.float32)   # module-style NCHW input
    x_nhwc = jnp.transpose(x_nchw, (0, 2, 3, 1))                   # cheap, once, on raw input

    # backbone weights (deterministic synthetic init), HWIO layout
    conv_w = jax.random.normal(k_conv, (3, 3, Cin, C_feat), jnp.float32) * jnp.sqrt(2.0 / (Cin * 9))
    conv_b = jnp.zeros((C_feat,), jnp.float32)

    # add_on_layers: kaiming-normal(fan_out) weights, zero bias (as _initialize_weights),
    # stored as (in, out) matrices for the per-pixel matmul formulation of 1x1 convs.
    w1 = jax.random.normal(k_w1, (C_feat, D), jnp.float32) * jnp.sqrt(2.0 / D)
    b1 = jnp.zeros((1, D), jnp.float32)
    w2 = jax.random.normal(k_w2, (D, D), jnp.float32) * jnp.sqrt(2.0 / D)
    b2 = jnp.zeros((1, D), jnp.float32)

    # prototype_vectors ~ U[0,1), shape (P, D, 1, 1) flattened to (P, D);
    # the `ones` parameter is implicit (conv with all-ones == channel-sum of x^2).
    protos = jax.random.uniform(k_proto, (P, D), jnp.float32)

    # last_layer: Linear(P -> K, bias=False); stored pre-transposed as (P, K)
    wlast_t = jax.random.normal(k_last, (P, K), jnp.float32) * 0.1

    feat = features_backbone(x_nhwc, conv_w, conv_b)               # (N, Hf, Wf, C_feat)
    Nf, Hf, Wf, Cf = feat.shape
    f_nsc = feat.reshape(Nf, Hf * Wf, Cf)                          # pure reshape, no transpose

    logits, min_d = ppnet_pallas(f_nsc, w1, b1, w2, b2, protos, wlast_t, b_tile=B_TILE)
    jax.block_until_ready((logits, min_d))

    logits_ref, min_d_ref = ppnet_ref(f_nsc, w1, b1, w2, b2, protos, wlast_t)
    assert logits.shape == (N, K) and min_d.shape == (N, P)
    assert jnp.allclose(logits, logits_ref, atol=1e-2, rtol=1e-2)
    assert jnp.allclose(min_d, min_d_ref, atol=1e-2, rtol=1e-2)

    print("KERNEL_OK")
</pallas_src>

<mosaic_0001>
module attributes {stable_mosaic.version = 11 : i64} {
  func.func @ppnet_kernel(%arg0: i32, %arg1: memref<1x256x8xf32, #tpu.memory_space<vmem>>, %arg2: memref<8x8xf32, #tpu.memory_space<vmem>>, %arg3: memref<1x8xf32, #tpu.memory_space<vmem>>, %arg4: memref<8x8xf32, #tpu.memory_space<vmem>>, %arg5: memref<1x8xf32, #tpu.memory_space<vmem>>, %arg6: memref<128x8xf32, #tpu.memory_space<vmem>>, %arg7: memref<128x128xf32, #tpu.memory_space<vmem>>, %arg8: memref<1x4x128xf32, #tpu.memory_space<vmem>>, %arg9: memref<1x4x128xf32, #tpu.memory_space<vmem>>) attributes {dimension_semantics = [#tpu.dimension_semantics<parallel>], iteration_bounds = array<i64: 2>, scalar_prefetch = 0 : i64, scratch_operands = 0 : i64, tpu.core_type = #tpu.core_type<tc>, window_params = [{transform_indices = @transform_0, window_bounds = array<i64: 1, 256, 8>}, {pipeline_mode = #tpu.pipeline_mode<synchronous>, transform_indices = @transform_1, window_bounds = array<i64: 8, 8>}, {pipeline_mode = #tpu.pipeline_mode<synchronous>, transform_indices = @transform_2, window_bounds = array<i64: 1, 8>}, {pipeline_mode = #tpu.pipeline_mode<synchronous>, transform_indices = @transform_3, window_bounds = array<i64: 8, 8>}, {pipeline_mode = #tpu.pipeline_mode<synchronous>, transform_indices = @transform_4, window_bounds = array<i64: 1, 8>}, {pipeline_mode = #tpu.pipeline_mode<synchronous>, transform_indices = @transform_5, window_bounds = array<i64: 128, 8>}, {pipeline_mode = #tpu.pipeline_mode<synchronous>, transform_indices = @transform_6, window_bounds = array<i64: 128, 128>}, {transform_indices = @transform_7, window_bounds = array<i64: 1, 4, 128>}, {transform_indices = @transform_8, window_bounds = array<i64: 1, 4, 128>}]} {
    %c0 = arith.constant 0 : index
    %c0_0 = arith.constant 0 : index
    %c0_1 = arith.constant 0 : index
    %0 = vector.load %arg1[%c0, %c0_0, %c0_1] : memref<1x256x8xf32, #tpu.memory_space<vmem>>, vector<1x256x8xf32>
    %1 = vector.shape_cast %0 : vector<1x256x8xf32> to vector<256x8xf32>
    %c0_2 = arith.constant 0 : index
    %c0_3 = arith.constant 0 : index
    %2 = vector.load %arg2[%c0_2, %c0_3] : memref<8x8xf32, #tpu.memory_space<vmem>>, vector<8x8xf32>
    %c0_4 = arith.constant 0 : index
    %c0_5 = arith.constant 0 : index
    %3 = vector.load %arg4[%c0_4, %c0_5] : memref<8x8xf32, #tpu.memory_space<vmem>>, vector<8x8xf32>
    %c0_6 = arith.constant 0 : index
    %c0_7 = arith.constant 0 : index
    %4 = vector.load %arg6[%c0_6, %c0_7] : memref<128x8xf32, #tpu.memory_space<vmem>>, vector<128x8xf32>
    %5 = arith.truncf %1 : vector<256x8xf32> to vector<256x8xbf16>
    %6 = arith.truncf %2 : vector<8x8xf32> to vector<8x8xbf16>
    %cst = arith.constant dense<0.000000e+00> : vector<256x8xf32>
    %7 = tpu.matmul %5, %6, %cst {dimension_numbers = #tpu.dot_dimension_numbers<[1], [0], [0], [1], [0, 0, 1, 1], [], []>} : vector<256x8xbf16>, vector<8x8xbf16>, vector<256x8xf32> -> vector<256x8xf32>
    %c0_8 = arith.constant 0 : index
    %c0_9 = arith.constant 0 : index
    %8 = vector.load %arg3[%c0_8, %c0_9] : memref<1x8xf32, #tpu.memory_space<vmem>>, vector<1x8xf32>
    %9 = vector.broadcast %8 : vector<1x8xf32> to vector<256x8xf32>
    %10 = arith.addf %7, %9 : vector<256x8xf32>
    %cst_10 = arith.constant 0.000000e+00 : f32
    %11 = vector.broadcast %cst_10 : f32 to vector<256x8xf32>
    %12 = arith.maximumf %10, %11 : vector<256x8xf32>
    %13 = arith.truncf %12 : vector<256x8xf32> to vector<256x8xbf16>
    %14 = arith.truncf %3 : vector<8x8xf32> to vector<8x8xbf16>
    %cst_11 = arith.constant dense<0.000000e+00> : vector<256x8xf32>
    %15 = tpu.matmul %13, %14, %cst_11 {dimension_numbers = #tpu.dot_dimension_numbers<[1], [0], [0], [1], [0, 0, 1, 1], [], []>} : vector<256x8xbf16>, vector<8x8xbf16>, vector<256x8xf32> -> vector<256x8xf32>
    %c0_12 = arith.constant 0 : index
    %c0_13 = arith.constant 0 : index
    %16 = vector.load %arg5[%c0_12, %c0_13] : memref<1x8xf32, #tpu.memory_space<vmem>>, vector<1x8xf32>
    %17 = vector.broadcast %16 : vector<1x8xf32> to vector<256x8xf32>
    %18 = arith.addf %15, %17 : vector<256x8xf32>
    %19 = arith.negf %18 : vector<256x8xf32>
    %20 = math.exp %19 : vector<256x8xf32>
    %cst_14 = arith.constant 1.000000e+00 : f32
    %21 = vector.broadcast %cst_14 : f32 to vector<256x8xf32>
    %22 = arith.addf %21, %20 : vector<256x8xf32>
    %23 = arith.divf %21, %22 : vector<256x8xf32>
    %24 = arith.mulf %23, %23 : vector<256x8xf32>
    %cst_15 = arith.constant dense<0.000000e+00> : vector<256xf32>
    %25 = vector.multi_reduction <add>, %24, %cst_15 [1] : vector<256x8xf32> to vector<256xf32>
    %26 = vector.shape_cast %25 : vector<256xf32> to vector<256x1xf32>
    %27 = arith.mulf %4, %4 : vector<128x8xf32>
    %cst_16 = arith.constant dense<0.000000e+00> : vector<128xf32>
    %28 = vector.multi_reduction <add>, %27, %cst_16 [1] : vector<128x8xf32> to vector<128xf32>
    %29 = vector.shape_cast %28 : vector<128xf32> to vector<1x128xf32>
    %30 = arith.truncf %23 : vector<256x8xf32> to vector<256x8xbf16>
    %31 = arith.truncf %4 : vector<128x8xf32> to vector<128x8xbf16>
    %32 = tpu.transpose %31, [1, 0] : vector<128x8xbf16> -> vector<8x128xbf16>
    %cst_17 = arith.constant dense<0.000000e+00> : vector<256x128xf32>
    %33 = tpu.matmul %30, %32, %cst_17 {dimension_numbers = #tpu.dot_dimension_numbers<[1], [0], [0], [1], [0, 0, 1, 1], [], []>} : vector<256x8xbf16>, vector<8x128xbf16>, vector<256x128xf32> -> vector<256x128xf32>
    %cst_18 = arith.constant 2.000000e+00 : f32
    %34 = vector.broadcast %cst_18 : f32 to vector<256x128xf32>
    %35 = arith.mulf %34, %33 : vector<256x128xf32>
    %36 = vector.broadcast %26 : vector<256x1xf32> to vector<256x128xf32>
    %37 = arith.subf %36, %35 : vector<256x128xf32>
    %38 = vector.broadcast %29 : vector<1x128xf32> to vector<256x128xf32>
    %39 = arith.addf %37, %38 : vector<256x128xf32>
    %cst_19 = arith.constant 0.000000e+00 : f32
    %40 = vector.broadcast %cst_19 : f32 to vector<256x128xf32>
    %41 = arith.maximumf %39, %40 : vector<256x128xf32>
    %42 = vector.shape_cast %41 : vector<256x128xf32> to vector<4x64x128xf32>
    %cst_20 = arith.constant dense<0x7F800000> : vector<4x128xf32>
    %43 = vector.multi_reduction <minimumf>, %42, %cst_20 [1] : vector<4x64x128xf32> to vector<4x128xf32>
    %cst_21 = arith.constant 1.000000e+00 : f32
    %44 = vector.broadcast %cst_21 : f32 to vector<4x128xf32>
    %45 = arith.addf %43, %44 : vector<4x128xf32>
    %46 = math.log %45 : vector<4x128xf32>
    %cst_22 = arith.constant 9.99999974E-5 : f32
    %47 = vector.broadcast %cst_22 : f32 to vector<4x128xf32>
    %48 = arith.addf %43, %47 : vector<4x128xf32>
    %49 = math.log %48 : vector<4x128xf32>
    %50 = arith.subf %46, %49 : vector<4x128xf32>
    %c0_23 = arith.constant 0 : index
    %c0_24 = arith.constant 0 : index
    %51 = vector.load %arg7[%c0_23, %c0_24] : memref<128x128xf32, #tpu.memory_space<vmem>>, vector<128x128xf32>
    %cst_25 = arith.constant dense<0.000000e+00> : vector<4x128xf32>
    %52 = tpu.matmul %50, %51, %cst_25 {dimension_numbers = #tpu.dot_dimension_numbers<[1], [0], [0], [1], [0, 0, 1, 1], [], []>} : vector<4x128xf32>, vector<128x128xf32>, vector<4x128xf32> -> vector<4x128xf32>
    %c0_26 = arith.constant 0 : index
    %c0_27 = arith.constant 0 : index
    %c0_28 = arith.constant 0 : index
    %53 = vector.load %arg9[%c0_26, %c0_27, %c0_28] : memref<1x4x128xf32, #tpu.memory_space<vmem>>, vector<1x4x128xf32>
    %54 = vector.shape_cast %53 : vector<1x4x128xf32> to vector<4x128xf32>
    %55 = vector.shape_cast %43 : vector<4x128xf32> to vector<1x4x128xf32>
    tpu.vector_store %arg9[%c0_26, %c0_27, %c0_28], %55 {strides = array<i32>} : memref<1x4x128xf32, #tpu.memory_space<vmem>>, vector<1x4x128xf32>,
    %c0_29 = arith.constant 0 : index
    %c0_30 = arith.constant 0 : index
    %c0_31 = arith.constant 0 : index
    %56 = vector.load %arg8[%c0_29, %c0_30, %c0_31] : memref<1x4x128xf32, #tpu.memory_space<vmem>>, vector<1x4x128xf32>
    %57 = vector.shape_cast %56 : vector<1x4x128xf32> to vector<4x128xf32>
    %58 = vector.shape_cast %52 : vector<4x128xf32> to vector<1x4x128xf32>
    tpu.vector_store %arg8[%c0_29, %c0_30, %c0_31], %58 {strides = array<i32>} : memref<1x4x128xf32, #tpu.memory_space<vmem>>, vector<1x4x128xf32>,
    return
  }
  func.func @transform_0(%arg0: i32) -> (i32, i32, i32) {
    %c0_i32 = arith.constant 0 : i32
    %c0_i32_0 = arith.constant 0 : i32
    %c0_i32_1 = arith.constant 0 : i32
    return %arg0, %c0_i32, %c0_i32_0 : i32, i32, i32
  }
  func.func @transform_1(%arg0: i32) -> (i32, i32) {
    %c0_i32 = arith.constant 0 : i32
    %c0_i32_0 = arith.constant 0 : i32
    %c0_i32_1 = arith.constant 0 : i32
    return %c0_i32, %c0_i32_0 : i32, i32
  }
  func.func @transform_2(%arg0: i32) -> (i32, i32) {
    %c0_i32 = arith.constant 0 : i32
    %c0_i32_0 = arith.constant 0 : i32
    %c0_i32_1 = arith.constant 0 : i32
    return %c0_i32, %c0_i32_0 : i32, i32
  }
  func.func @transform_3(%arg0: i32) -> (i32, i32) {
    %c0_i32 = arith.constant 0 : i32
    %c0_i32_0 = arith.constant 0 : i32
    %c0_i32_1 = arith.constant 0 : i32
    return %c0_i32, %c0_i32_0 : i32, i32
  }
  func.func @transform_4(%arg0: i32) -> (i32, i32) {
    %c0_i32 = arith.constant 0 : i32
    %c0_i32_0 = arith.constant 0 : i32
    %c0_i32_1 = arith.constant 0 : i32
    return %c0_i32, %c0_i32_0 : i32, i32
  }
  func.func @transform_5(%arg0: i32) -> (i32, i32) {
    %c0_i32 = arith.constant 0 : i32
    %c0_i32_0 = arith.constant 0 : i32
    %c0_i32_1 = arith.constant 0 : i32
    return %c0_i32, %c0_i32_0 : i32, i32
  }
  func.func @transform_6(%arg0: i32) -> (i32, i32) {
    %c0_i32 = arith.constant 0 : i32
    %c0_i32_0 = arith.constant 0 : i32
    %c0_i32_1 = arith.constant 0 : i32
    return %c0_i32, %c0_i32_0 : i32, i32
  }
  func.func @transform_7(%arg0: i32) -> (i32, i32, i32) {
    %c0_i32 = arith.constant 0 : i32
    %c0_i32_0 = arith.constant 0 : i32
    %c0_i32_1 = arith.constant 0 : i32
    return %arg0, %c0_i32, %c0_i32_0 : i32, i32, i32
  }
  func.func @transform_8(%arg0: i32) -> (i32, i32, i32) {
    %c0_i32 = arith.constant 0 : i32
    %c0_i32_0 = arith.constant 0 : i32
    %c0_i32_1 = arith.constant 0 : i32
    return %arg0, %c0_i32, %c0_i32_0 : i32, i32, i32
  }
}

</mosaic_0001>

<bundles_post_ra>
// kernel: tpu_custom_call.1
= control target key start
LH: loop header
LB: loop body
LE: loop exit
PB: predicated region body
PF: predicated region fallthrough
CT: control target
= control target key end

     0   :  { %14 = vsyncpa [#allocation3], 0  ;;  %s3539_s0 = inlined_call_operand.vmem [shape: f32[2,256,8], index: 0, kind: input, shape index: {}]   ;;  %s3540_s1 = inlined_call_operand.vmem [shape: f32[8,8], index: 1, kind: input, shape index: {}]   ;;  %s3541_s2 = inlined_call_operand.vmem [shape: f32[1,8], index: 2, kind: input, shape index: {}]   ;;  %s3542_s3 = inlined_call_operand.vmem [shape: f32[8,8], index: 3, kind: input, shape index: {}]   ;;  %s3543_s4 = inlined_call_operand.vmem [shape: f32[1,8], index: 4, kind: input, shape index: {}]   ;;  %s3544_s5 = inlined_call_operand.vmem [shape: f32[128,8], index: 5, kind: input, shape index: {}]   ;;  %s3545_s6 = inlined_call_operand.vmem [shape: f32[128,128], index: 6, kind: input, shape index: {}]   ;;  %s3546_s7 = inlined_call_operand.hbm [shape: f32[2,4,128], index: 7, kind: output, shape index: {0}]   ;;  %s3547_s8 = inlined_call_operand.hbm [shape: f32[2,4,128], index: 8, kind: output, shape index: {1}]  }
   0x1   :  { %16 = vsyncpa [#allocation3 + $0x1], 0 }
   0x2   :  { %17 = vsyncpa [#allocation5], 0 }
   0x3   :  { %19 = vsyncpa [#allocation5 + $0x1], 0  ;;  %s2807_s27 = smov 0   ;;  %s2809_s28 = smov 0  }
   0x4   :  { %s2811_s29 = smov 0   ;;  %s2813_s30 = smov 0  }
   0x5 LB: > { %s2828_s9 = sadd.s32 4294967295, %s2755_s30   ;;  %s2089_s10 = sadd.s32 4294967294, %s2755_s30   ;;  %s2755_s30 = sphi %s2813_s30, %s3555_s30   ;;  %s2751_s29 = sphi %s2811_s29, %s3554_s29   ;;  %s2747_s28 = sphi %s2809_s28, %s3553_s28   ;;  %s2743_s27 = sphi %s2807_s27, %s3552_s27  }
   0x6   : > { %s2832_s11 = sadd.s32 1, %s2755_s30   ;;  %s184_s12 = sadd.s32 1, %s2751_s29 }
   0x7   : > { %s181_s13 = ssub.s32 %s2755_s30, %s2832_s11  ;;  %p194_p0 = scmp.ne.s32.totalorder %s2751_s29, %s2747_s28 }
   0x8   : > { %p182_p1 = scmp.eq.s32.totalorder %s181_s13, 0  ;;  %p195_p2 = scmp.eq.s32.totalorder %s2828_s9, 1 }
   0x9   : > { %p200_p3 = scmp.ne.s32.totalorder %s2747_s28, %s2743_s27  ;;  %p201_p4 = scmp.eq.s32.totalorder %s2089_s10, 1 }
   0xa   : > { %s2843_s14 = scalar_select %p182_p1, %s2751_s29, %s184_s12  }
   0xb   : > { %p2845_p5 = por %p195_p2, %p194_p0  ;;  %p2849_p6 = por %p201_p4, %p200_p3 }
   0xc   : > { %p2092_p7 = scmp.ge.s32.totalorder %s2755_s30, 1  ;;  %p271_p8 = scmp.lt.s32.totalorder %s2755_s30, 3 }
   0xe   : > { %p272_p9 = pnand %p2092_p7, %p271_p8 }
   0xf   : > { %v348_v0 = vld [vmem:[%s3540_s1] sm:$0xff] (!%p272_p9)  ;;  %vm439_vm0 = vcmask (!%p272_p9), 1043456   ;;  %p310_p10 = scmp.lt.s32.totalorder (!%p272_p9), %s2828_s9, 1  ;;  %vm390_vm1 = vcmask (!%p272_p9), 64512   ;;  %v2926_v55 = vld [vmem:[%s3544_s5 + $0x8] sm:$0xff] (!%p272_p9)  ;;  %v2931_v56 = vld [vmem:[%s3544_s5 + $0x10] sm:$0xff] (!%p272_p9) }
  0x10   : > { %275 = sbr.rel (%p272_p9) target bundleno = 1044 (0x414), region = 48  ;;  %v382_v1 = vpack.c.bf16 (!%p272_p9), %v348_v0, %v348_v0  ;;  %v349_v51 = vld [vmem:[%s3542_s3] sm:$0xff] (!%p272_p9)  ;;  %v2937_v58 = vld [vmem:[%s3544_s5 + $0x18] sm:$0xff] (!%p272_p9)  ;;  %v2954_v0 = vld [vmem:[%s3544_s5 + $0x28] sm:$0xff] (!%p272_p9)  ;;  %vm1604_vm2 = vcmask (!%p272_p9), 130112   ;;  %vm1611_vm3 = vcmask (!%p272_p9), 195712  }
  0x11   : > { %v652_v52 = vpack.c.bf16 (!%p272_p9), %v349_v51, %v349_v51  ;;  %v350_v54 = vld [vmem:[%s3544_s5] sm:$0xff] (!%p272_p9)  ;;  %v1273_v60 = vpack.c.bf16 (!%p272_p9), %v2937_v58, %v2931_v56  ;;  %vm2758_vm4 = vmmov (!%p272_p9), 0   ;;  %vm1618_vm5 = vcmask (!%p272_p9), 261312   ;;  %s3455_s13 = sand.u32 (!%p272_p9), 1, %s2747_s28   ;;  %s2760_s26 = smov (!%p272_p9), [#allocation4]  }
  0x12   : > { %2452 = vmatprep.subr.msk.bf16.mxu0 (!%p272_p9), %vm439_vm0, %v382_v1  ;;  %v441_v2 = vsel (!%p272_p9), %vm439_vm0, %v382_v1, 0  ;;  %v1272_v57 = vpack.c.bf16 (!%p272_p9), %v2926_v55, %v350_v54  ;;  %v1192_v59 = vmul.f32 (!%p272_p9), %v350_v54, %v350_v54  ;;  %v2949_v63 = vld [vmem:[%s3544_s5 + $0x20] sm:$0xff] (!%p272_p9)  ;;  %vm1625_vm6 = vcmask (!%p272_p9), 326912   ;;  %s2093_s17 = sshll.u32 (!%p272_p9), %s3455_s13, 2  ;;  %s1972_s24 = scalar_lea.sflag (!%p272_p9), [#allocation5], %s3455_s13 }
  0x13   : > { %2262 = vmatpush3.bf16.msra.mxu0 (!%p272_p9), %v441_v2  ;;  %2453 = vmatprep.subr.msk.bf16.mxu1 (!%p272_p9), %vm439_vm0, %v652_v52  ;;  %v709_v53 = vsel (!%p272_p9), %vm439_vm0, %v652_v52, 0  ;;  %v1332_v1 = vsel (!%p272_p9), %vm390_vm1, %v1273_v60, 0  ;;  %v1274_v2 = vpack.c.bf16 (!%p272_p9), %v2954_v0, %v2949_v63  ;;  %vm1632_vm7 = vcmask (!%p272_p9), 392512   ;;  %s309_s18 = scalar_lea.vmem (!%p272_p9), [#allocation4], %s2093_s17  ;;  %s2665_s10 = sshll.u32 (!%p272_p9), %s2760_s26, 4  ;;  %s2666_s10 = int_to_ptr.vmem [resolvable:$false] %s2665_s10 }
  0x14   : > { %2296 = vmatpush3.bf16.msra.mxu1 (!%p272_p9), %v709_v53  ;;  %2454 = vmatprep.subr.msk.bf16.mxu0 (!%p272_p9), %vm390_vm1, %v1272_v57  ;;  %v1329_v61 = vsel (!%p272_p9), %vm390_vm1, %v1272_v57, 0  ;;  %v1208_v62 = vsel (!%p272_p9), %vm390_vm1, %v1192_v59, 0.0  ;;  %vm1639_vm8 = vcmask (!%p272_p9), 458112   ;;  %vm1646_vm9 = vcmask (!%p272_p9), 523712   ;;  %s2667_s12 = scalar_lea.vmem (!%p272_p9), %s2666_s10, 128 }
  0x15   : > { %2455 = vmatprep.subr.msk.bf16.mxu1 (!%p272_p9), %vm390_vm1, %v1272_v57  ;;  %1209 = vadd.xlane.f32.xlu0 (!%p272_p9), %v1208_v62  ;;  %vm1653_vm10 = vcmask (!%p272_p9), 589312   ;;  %vm1660_vm11 = vcmask (!%p272_p9), 654912   ;;  %vm1667_vm12 = vcmask (!%p272_p9), 720512   ;;  %vm1674_vm13 = vcmask (!%p272_p9), 786112  }
  0x16   : > { %vm1681_vm14 = vcmask (!%p272_p9), 851712   ;;  %vm1688_vm15 = vcmask (!%p272_p9), 917312   ;;  %vm1695_vm0 = vcmask (!%p272_p9), 982912  }
  0x17   : > { %s311_s19 = scalar_select %p310_p10, %s2828_s9, 1 }
  0x19   : > { %s2185_s20 = sshll.u32 %s311_s19, 8  ;;  %s3548_s19 = sshll.u32 %s2828_s9, 6 }
  0x1a   : > { %s2865_s23 = scalar_lea.vmem %s3539_s0, %s2185_s20  ;;  %s3469_s22 = scalar_lea.hbm %s3547_s8, %s3548_s19 }
  0x1b   : > { %v316_v3 = vld [vmem:[%s2865_s23] sm:$0xff]  ;;  %v317_v4 = vld [vmem:[%s2865_s23 + $0x8] sm:$0xff]  ;;  %v318_v5 = vld [vmem:[%s2865_s23 + $0x10] sm:$0xff] }
  0x1c   : > { %v366_v6 = vpack.c.bf16 %v317_v4, %v316_v3  ;;  %v319_v7 = vld [vmem:[%s2865_s23 + $0x18] sm:$0xff]  ;;  %v320_v8 = vld [vmem:[%s2865_s23 + $0x20] sm:$0xff]  ;;  %v321_v9 = vld [vmem:[%s2865_s23 + $0x28] sm:$0xff] }
  0x1d   : > { %v367_v10 = vpack.c.bf16 %v319_v7, %v318_v5  ;;  %v368_v11 = vpack.c.bf16 %v321_v9, %v320_v8  ;;  %v322_v12 = vld [vmem:[%s2865_s23 + $0x30] sm:$0xff]  ;;  %v323_v13 = vld [vmem:[%s2865_s23 + $0x38] sm:$0xff]  ;;  %v324_v14 = vld [vmem:[%s2865_s23 + $0x40] sm:$0xff]  ;;  %v2971_v5 = vsel %vm390_vm1, %v1274_v2, 0 }
  0x1e   : > { %2263 = vmatprep.mubr.msk.bf16.mxu0 %vm390_vm1, %v366_v6  ;;  %v325_v15 = vld [vmem:[%s2865_s23 + $0x48] sm:$0xff]  ;;  %v369_v16 = vpack.c.bf16 %v323_v13, %v322_v12  ;;  %v326_v18 = vld [vmem:[%s2865_s23 + $0x50] sm:$0xff]  ;;  %v327_v19 = vld [vmem:[%s2865_s23 + $0x58] sm:$0xff] }
  0x1f   : > { %2264 = vmatmul.mubr.msk.bf16.vlgmr.msra.gmra.mrb[0].mxu0 %vm390_vm1, %v367_v10  ;;  %v370_v17 = vpack.c.bf16 %v325_v15, %v324_v14  ;;  %v328_v20 = vld [vmem:[%s2865_s23 + $0x60] sm:$0xff]  ;;  %v329_v21 = vld [vmem:[%s2865_s23 + $0x68] sm:$0xff]  ;;  %v371_v22 = vpack.c.bf16 %v327_v19, %v326_v18  ;;  %v330_v24 = vld [vmem:[%s2865_s23 + $0x70] sm:$0xff] }
  0x20   : > { %2267 = vmatprep.mubr.msk.bf16.mxu0 %vm390_vm1, %v368_v11  ;;  %v372_v23 = vpack.c.bf16 %v329_v21, %v328_v20  ;;  %v331_v25 = vld [vmem:[%s2865_s23 + $0x78] sm:$0xff]  ;;  %v332_v26 = vld [vmem:[%s2865_s23 + $0x80] sm:$0xff]  ;;  %v333_v27 = vld [vmem:[%s2865_s23 + $0x88] sm:$0xff]  ;;  %2330 = vmatpush3.bf16.xpose.msra.mxu0 %v1329_v61 }
  0x21   : > { %v373_v28 = vpack.c.bf16 %v331_v25, %v330_v24  ;;  %v374_v29 = vpack.c.bf16 %v333_v27, %v332_v26  ;;  %v334_v30 = vld [vmem:[%s2865_s23 + $0x90] sm:$0xff]  ;;  %v335_v31 = vld [vmem:[%s2865_s23 + $0x98] sm:$0xff]  ;;  %v336_v32 = vld [vmem:[%s2865_s23 + $0xa0] sm:$0xff]  ;;  %2456 = vmatprep.subr.msk.bf16.mxu0 %vm390_vm1, %v1273_v60 }
  0x22   : > { %v337_v33 = vld [vmem:[%s2865_s23 + $0xa8] sm:$0xff]  ;;  %v375_v34 = vpack.c.bf16 %v335_v31, %v334_v30  ;;  %v338_v36 = vld [vmem:[%s2865_s23 + $0xb0] sm:$0xff]  ;;  %v339_v37 = vld [vmem:[%s2865_s23 + $0xb8] sm:$0xff] }
  0x23   : > { %v376_v35 = vpack.c.bf16 %v337_v33, %v336_v32  ;;  %v340_v38 = vld [vmem:[%s2865_s23 + $0xc0] sm:$0xff]  ;;  %v341_v39 = vld [vmem:[%s2865_s23 + $0xc8] sm:$0xff]  ;;  %v377_v40 = vpack.c.bf16 %v339_v37, %v338_v36  ;;  %v342_v42 = vld [vmem:[%s2865_s23 + $0xd0] sm:$0xff] }
  0x24   : > { %v378_v41 = vpack.c.bf16 %v341_v39, %v340_v38  ;;  %v343_v43 = vld [vmem:[%s2865_s23 + $0xd8] sm:$0xff]  ;;  %v344_v44 = vld [vmem:[%s2865_s23 + $0xe0] sm:$0xff]  ;;  %v345_v45 = vld [vmem:[%s2865_s23 + $0xe8] sm:$0xff] }
  0x25   : > { %v379_v46 = vpack.c.bf16 %v343_v43, %v342_v42  ;;  %v380_v47 = vpack.c.bf16 %v345_v45, %v344_v44  ;;  %v346_v48 = vld [vmem:[%s2865_s23 + $0xf0] sm:$0xff]  ;;  %v347_v49 = vld [vmem:[%s2865_s23 + $0xf8] sm:$0xff]  ;;  %v2988_v8 = vld [vmem:[%s3541_s2] ss:$0 sm:$0xff]  ;;  %s1998_s23 = sshll.u32 %s309_s18, 4  ;;  %s1999_s23 = int_to_ptr.vmem [resolvable:$true] %s1998_s23 }
  0x26   : > { %v381_v50 = vpack.c.bf16 %v347_v49, %v346_v48  ;;  %v2963_v3 = vld [vmem:[%s3544_s5 + $0x30] sm:$0xff]  ;;  %v2968_v4 = vld [vmem:[%s3544_s5 + $0x38] sm:$0xff]  ;;  %s2661_s25 = scalar_lea.vmem %s1999_s23, 64  ;;  %p2668_p0 = scmp.lt.s32.totalorder %s1999_s23, %s2666_s10 }
  0x27   : > { %2268 = vmatmul.mubr.msk.bf16.gmra.mrb[4].mxu0 %vm390_vm1, %v369_v16  ;;  %v2975_v6 = vpack.c.bf16 %v2968_v4, %v2963_v3  ;;  %p2662_p11 = scmp.ne.s32.totalorder %s1999_s23, %s2661_s25  ;;  %p2669_p1 = scmp.lt.s32.totalorder %s2667_s12, %s2661_s25 }
  0x28   : > { %2271 = vmatprep.mubr.msk.bf16.mxu0 %vm390_vm1, %v370_v17  ;;  %2332 = vmatpush3.bf16.xpose.msra.mxu0 %v1332_v1 }
  0x29   : > { %2458 = vmatprep.subr.msk.bf16.mxu0 %vm390_vm1, %v1274_v2  ;;  %v2982_v7 = vsel %vm390_vm1, %v2975_v6, 0  ;;  %p2663_p12 = pnand %p2662_p11, %p2845_p5  ;;  %p2670_p2 = por %p2669_p1, %p2668_p0 }
  0x2b   : > { %p2664_p13 = pneg %p2663_p12 }
  0x2d   : > { %p2671_p3 = pnand %p2670_p2, %p2664_p13 }
  0x2f   : > { %2272 = vmatmul.mubr.msk.bf16.gmra.mrb[8].mxu0 %vm390_vm1, %v371_v22 }
  0x30   : > { %2275 = vmatprep.mubr.msk.bf16.mxu0 %vm390_vm1, %v372_v23  ;;  %2334 = vmatpush3.bf16.xpose.msra.mxu0 %v2971_v5 }
  0x31   : > { %2460 = vmatprep.subr.msk.bf16.mxu0 %vm390_vm1, %v2975_v6 }
  0x37   : > { %2276 = vmatmul.mubr.msk.bf16.gmra.mrb[12].mxu0 %vm390_vm1, %v373_v28 }
  0x38   : > { %2279 = vmatprep.mubr.msk.bf16.mxu0 %vm390_vm1, %v374_v29  ;;  %2336 = vmatpush3.bf16.xpose.msra.mxu0 %v2982_v7 }
  0x3f   : > { %2280 = vmatmul.mubr.msk.bf16.gmra.mrb[16].mxu0 %vm390_vm1, %v375_v34 }
  0x40   : > { %2283 = vmatprep.mubr.msk.bf16.mxu0 %vm390_vm1, %v376_v35 }
  0x47   : > { %2284 = vmatmul.mubr.msk.bf16.gmra.mrb[20].mxu0 %vm390_vm1, %v377_v40 }
  0x48   : > { %2287 = vmatprep.mubr.msk.bf16.mxu0 %vm390_vm1, %v378_v41 }
  0x4f   : > { %2288 = vmatmul.mubr.msk.bf16.gmra.mrb[24].mxu0 %vm390_vm1, %v379_v46 }
  0x50   : > { %2291 = vmatprep.mubr.msk.bf16.mxu0 %vm390_vm1, %v380_v47 }
  0x57   : > { %2292 = vmatmul.mubr.msk.bf16.gmra.mrb[28].mxu0 %vm390_vm1, %v381_v50 }
  0xf2   : > { %v2265_v9 = vpop.f32.mrb[0].mxu0 }
  0xf3   : > { %v486_v10 = vadd.f32 %v2265_v9, %v2988_v8  ;;  %v477_v11 = vpop.f32.mrb[1].mxu0 }
  0xf4   : > { %v478_v12 = vadd.f32 %v2988_v8, %v477_v11  ;;  %v2266_v13 = vpop.f32.mrb[2].mxu0 }
  0xf5   : > { %v489_v14 = vadd.f32 %v2266_v13, %v2988_v8  ;;  %v480_v15 = vpop.f32.mrb[3].mxu0  ;;  %v606_v17 = vmax.f32 %v486_v10, 0.0 }
  0xf6   : > { %v481_v16 = vadd.f32 %v2988_v8, %v480_v15  ;;  %v604_v19 = vmax.f32 %v478_v12, 0.0 }
  0xf7   : > { %v607_v18 = vmax.f32 %v489_v14, 0.0 }
  0xf8   : > { %v605_v20 = vmax.f32 %v481_v16, 0.0 }
  0xf9   : > { %v637_v21 = vpack.c.bf16 %v607_v18, %v606_v17 }
  0xfa   : > { %v2269_v22 = vpop.f32.mrb[4].mxu0  ;;  %v636_v23 = vpack.c.bf16 %v605_v20, %v604_v19 }
  0xfb   : > { %v502_v24 = vadd.f32 %v2269_v22, %v2988_v8  ;;  %v493_v25 = vpop.f32.mrb[5].mxu0 }
  0xfc   : > { %v494_v26 = vadd.f32 %v2988_v8, %v493_v25  ;;  %v2270_v27 = vpop.f32.mrb[6].mxu0  ;;  %2297 = vmatprep.mubr.msk.bf16.mxu1 %vm390_vm1, %v636_v23 }
  0xfd   : > { %v505_v28 = vadd.f32 %v2270_v27, %v2988_v8  ;;  %v496_v29 = vpop.f32.mrb[7].mxu0  ;;  %2298 = vmatmul.mubr.msk.bf16.vlgmr.msra.gmra.mrb[0].mxu1 %vm390_vm1, %v637_v21  ;;  %v610_v31 = vmax.f32 %v502_v24, 0.0 }
  0xfe   : > { %v497_v30 = vadd.f32 %v2988_v8, %v496_v29  ;;  %2444 = vmatpush3.bf16.xpose.msra.mxu1 %v1329_v61  ;;  %v608_v33 = vmax.f32 %v494_v26, 0.0 }
  0xff   : > { %v611_v32 = vmax.f32 %v505_v28, 0.0  ;;  %2457 = vmatprep.subr.msk.bf16.mxu1 %vm390_vm1, %v1273_v60 }
 0x100   : > { %v609_v34 = vmax.f32 %v497_v30, 0.0 }
 0x101   : > { %v639_v35 = vpack.c.bf16 %v611_v32, %v610_v31 }
 0x102   : > { %v638_v36 = vpack.c.bf16 %v609_v34, %v608_v33  ;;  %v2273_v37 = vpop.f32.mrb[8].mxu0 }
 0x103   : > { %v518_v38 = vadd.f32 %v2273_v37, %v2988_v8  ;;  %v509_v39 = vpop.f32.mrb[9].mxu0 }
 0x104   : > { %v510_v40 = vadd.f32 %v2988_v8, %v509_v39  ;;  %v2274_v41 = vpop.f32.mrb[10].mxu0  ;;  %2301 = vmatprep.mubr.msk.bf16.mxu1 %vm390_vm1, %v638_v36 }
 0x105   : > { %v521_v42 = vadd.f32 %v2274_v41, %v2988_v8  ;;  %v512_v43 = vpop.f32.mrb[11].mxu0  ;;  %2302 = vmatmul.mubr.msk.bf16.gmra.mrb[4].mxu1 %vm390_vm1, %v639_v35  ;;  %v614_v45 = vmax.f32 %v518_v38, 0.0 }
 0x106   : > { %v513_v44 = vadd.f32 %v2988_v8, %v512_v43  ;;  %2445 = vmatpush3.bf16.xpose.msra.mxu1 %v1332_v1  ;;  %v612_v47 = vmax.f32 %v510_v40, 0.0 }
 0x107   : > { %v615_v46 = vmax.f32 %v521_v42, 0.0  ;;  %2459 = vmatprep.subr.msk.bf16.mxu1 %vm390_vm1, %v1274_v2 }
 0x108   : > { %v613_v48 = vmax.f32 %v513_v44, 0.0 }
 0x109   : > { %v641_v49 = vpack.c.bf16 %v615_v46, %v614_v45 }
 0x10a   : > { %v640_v50 = vpack.c.bf16 %v613_v48, %v612_v47  ;;  %v2277_v51 = vpop.f32.mrb[12].mxu0 }
 0x10b   : > { %v534_v52 = vadd.f32 %v2277_v51, %v2988_v8  ;;  %v525_v53 = vpop.f32.mrb[13].mxu0 }
 0x10c   : > { %v526_v54 = vadd.f32 %v2988_v8, %v525_v53  ;;  %v2278_v57 = vpop.f32.mrb[14].mxu0  ;;  %2305 = vmatprep.mubr.msk.bf16.mxu1 %vm390_vm1, %v640_v50 }
 0x10d   : > { %v537_v59 = vadd.f32 %v2278_v57, %v2988_v8  ;;  %v528_v60 = vpop.f32.mrb[15].mxu0  ;;  %2306 = vmatmul.mubr.msk.bf16.gmra.mrb[8].mxu1 %vm390_vm1, %v641_v49  ;;  %v618_v62 = vmax.f32 %v534_v52, 0.0 }
 0x10e   : > { %v529_v61 = vadd.f32 %v2988_v8, %v528_v60  ;;  %2446 = vmatpush3.bf16.xpose.msra.mxu1 %v2971_v5  ;;  %v616_v2 = vmax.f32 %v526_v54, 0.0 }
 0x10f   : > { %v619_v1 = vmax.f32 %v537_v59, 0.0  ;;  %2461 = vmatprep.subr.msk.bf16.mxu1 %vm390_vm1, %v2975_v6 }
 0x110   : > { %v617_v9 = vmax.f32 %v529_v61, 0.0 }
 0x111   : > { %v643_v10 = vpack.c.bf16 %v619_v1, %v618_v62 }
 0x112   : > { %v642_v11 = vpack.c.bf16 %v617_v9, %v616_v2  ;;  %v2281_v12 = vpop.f32.mrb[16].mxu0 }
 0x113   : > { %v550_v13 = vadd.f32 %v2281_v12, %v2988_v8  ;;  %v541_v14 = vpop.f32.mrb[17].mxu0  ;;  %v1194_v12 = vmul.f32 %v2931_v56, %v2931_v56 }
 0x114   : > { %v542_v15 = vadd.f32 %v2988_v8, %v541_v14  ;;  %v2282_v16 = vpop.f32.mrb[18].mxu0  ;;  %2309 = vmatprep.mubr.msk.bf16.mxu1 %vm390_vm1, %v642_v11 }
 0x115   : > { %v553_v5 = vadd.f32 %v2282_v16, %v2988_v8  ;;  %v544_v17 = vpop.f32.mrb[19].mxu0  ;;  %2310 = vmatmul.mubr.msk.bf16.gmra.mrb[12].mxu1 %vm390_vm1, %v643_v10  ;;  %v622_v18 = vmax.f32 %v550_v13, 0.0  ;;  %v358_v13 = vld [vmem:[%s3544_s5 + $0x40] sm:$0xff]  ;;  %v1214_v14 = vsel %vm390_vm1, %v1194_v12, 0.0  ;;  %v1193_v16 = vmul.f32 %v2926_v55, %v2926_v55 }
 0x116   : > { %v545_v6 = vadd.f32 %v2988_v8, %v544_v17  ;;  %2447 = vmatpush3.bf16.xpose.msra.mxu1 %v2982_v7  ;;  %v620_v20 = vmax.f32 %v542_v15, 0.0  ;;  %1215 = vadd.xlane.f32.xlu1 %v1214_v14  ;;  %v1195_v17 = vmul.f32 %v2937_v58, %v2937_v58  ;;  %v360_v58 = vld [vmem:[%s3544_s5 + $0x50] sm:$0xff] }
 0x117   : > { %v623_v19 = vmax.f32 %v553_v5, 0.0  ;;  %v1211_v5 = vsel %vm390_vm1, %v1193_v16, 0.0 }
 0x118   : > { %v621_v21 = vmax.f32 %v545_v6, 0.0  ;;  %1212 = vadd.xlane.f32.xlu0 %v1211_v5  ;;  %v1217_v6 = vsel %vm390_vm1, %v1195_v17, 0.0  ;;  %v1210_v17 = vpop.xlane.xlu0 %1209 }
 0x119   : > { %v645_v22 = vpack.c.bf16 %v623_v19, %v622_v18  ;;  %v1196_v18 = vmul.f32 %v2949_v63, %v2949_v63  ;;  %v1197_v19 = vmul.f32 %v2954_v0, %v2954_v0  ;;  %v1198_v63 = vmul.f32 %v2963_v3, %v2963_v3 }
 0x11a   : > { %v644_v23 = vpack.c.bf16 %v621_v21, %v620_v20  ;;  %v2285_v24 = vpop.f32.mrb[20].mxu0  ;;  %1218 = vadd.xlane.f32.xlu1 %v1217_v6  ;;  %v361_v20 = vld [vmem:[%s3544_s5 + $0x58] sm:$0xff] }
 0x11b   : > { %v566_v25 = vadd.f32 %v2285_v24, %v2988_v8  ;;  %v557_v26 = vpop.f32.mrb[21].mxu0  ;;  %v1220_v55 = vsel %vm390_vm1, %v1196_v18, 0.0  ;;  %v1223_v21 = vsel %vm390_vm1, %v1197_v19, 0.0  ;;  %v1226_v0 = vsel %vm390_vm1, %v1198_v63, 0.0 }
 0x11c   : > { %v558_v27 = vadd.f32 %v2988_v8, %v557_v26  ;;  %v2286_v28 = vpop.f32.mrb[22].mxu0  ;;  %2313 = vmatprep.mubr.msk.bf16.mxu1 %vm390_vm1, %v644_v23  ;;  %1221 = vadd.xlane.f32.xlu0 %v1220_v55  ;;  %v1199_v24 = vmul.f32 %v2968_v4, %v2968_v4  ;;  %v1200_v26 = vmul.f32 %v358_v13, %v358_v13  ;;  %v363_v4 = vld [vmem:[%s3544_s5 + $0x68] sm:$0xff] }
 0x11d   : > { %v569_v29 = vadd.f32 %v2286_v28, %v2988_v8  ;;  %v560_v30 = vpop.f32.mrb[23].mxu0  ;;  %2314 = vmatmul.mubr.msk.bf16.gmra.mrb[16].mxu1 %vm390_vm1, %v645_v22  ;;  %v626_v31 = vmax.f32 %v566_v25, 0.0  ;;  %v1277_v22 = vpack.c.bf16 %v361_v20, %v360_v58  ;;  %v362_v28 = vld [vmem:[%s3544_s5 + $0x60] sm:$0xff] }
 0x11e   : > { %v561_v7 = vadd.f32 %v2988_v8, %v560_v30  ;;  %v624_v33 = vmax.f32 %v558_v27, 0.0  ;;  %1224 = vadd.xlane.f32.xlu1 %v1223_v21  ;;  %v1229_v25 = vsel %vm390_vm1, %v1199_v24, 0.0  ;;  %v1232_v3 = vsel %vm390_vm1, %v1200_v26, 0.0 }
 0x11f   : > { %v627_v32 = vmax.f32 %v569_v29, 0.0  ;;  %v1344_v23 = vsel %vm390_vm1, %v1277_v22, 0  ;;  %v1278_v30 = vpack.c.bf16 %v363_v4, %v362_v28 }
 0x120   : > { %v625_v34 = vmax.f32 %v561_v7, 0.0  ;;  %1227 = vadd.xlane.f32.xlu0 %v1226_v0  ;;  %v1202_v7 = vmul.f32 %v360_v58, %v360_v58 }
 0x121   : > { %v647_v35 = vpack.c.bf16 %v627_v32, %v626_v31  ;;  %v1347_v32 = vsel %vm390_vm1, %v1278_v30, 0 }
 0x122   : > { %v646_v36 = vpack.c.bf16 %v625_v34, %v624_v33  ;;  %v2289_v37 = vpop.f32.mrb[24].mxu0  ;;  %1230 = vadd.xlane.f32.xlu1 %v1229_v25  ;;  %v1238_v31 = vsel %vm390_vm1, %v1202_v7, 0.0  ;;  %v1203_v33 = vmul.f32 %v361_v20, %v361_v20 }
 0x123   : > { %v582_v38 = vadd.f32 %v2289_v37, %v2988_v8  ;;  %v573_v39 = vpop.f32.mrb[25].mxu0  ;;  %v1205_v37 = vmul.f32 %v363_v4, %v363_v4 }
 0x124   : > { %v574_v40 = vadd.f32 %v2988_v8, %v573_v39  ;;  %v2290_v41 = vpop.f32.mrb[26].mxu0  ;;  %2317 = vmatprep.mubr.msk.bf16.mxu1 %vm390_vm1, %v646_v36  ;;  %1233 = vadd.xlane.f32.xlu0 %v1232_v3  ;;  %v1241_v34 = vsel %vm390_vm1, %v1203_v33, 0.0  ;;  %v365_v39 = vld [vmem:[%s3544_s5 + $0x78] sm:$0xff] }
 0x125   : > { %v585_v42 = vadd.f32 %v2290_v41, %v2988_v8  ;;  %v576_v43 = vpop.f32.mrb[27].mxu0  ;;  %2318 = vmatmul.mubr.msk.bf16.gmra.mrb[20].mxu1 %vm390_vm1, %v647_v35  ;;  %v630_v45 = vmax.f32 %v582_v38, 0.0  ;;  %v1204_v35 = vmul.f32 %v362_v28, %v362_v28  ;;  %v364_v38 = vld [vmem:[%s3544_s5 + $0x70] sm:$0xff] }
 0x126   : > { %v577_v44 = vadd.f32 %v2988_v8, %v576_v43  ;;  %v628_v47 = vmax.f32 %v574_v40, 0.0  ;;  %v1247_v40 = vsel %vm390_vm1, %v1205_v37, 0.0  ;;  %v1279_v41 = vpack.c.bf16 %v365_v39, %v364_v38 }
 0x127   : > { %v631_v46 = vmax.f32 %v585_v42, 0.0  ;;  %v1244_v36 = vsel %vm390_vm1, %v1204_v35, 0.0  ;;  %v1206_v42 = vmul.f32 %v364_v38, %v364_v38 }
 0x128   : > { %v629_v48 = vmax.f32 %v577_v44, 0.0  ;;  %1239 = vadd.xlane.f32.xlu0 %v1238_v31  ;;  %v1350_v44 = vsel %vm390_vm1, %v1279_v41, 0 }
 0x129   : > { %v649_v49 = vpack.c.bf16 %v631_v46, %v630_v45  ;;  %v1250_v43 = vsel %vm390_vm1, %v1206_v42, 0.0  ;;  %v1207_v45 = vmul.f32 %v365_v39, %v365_v39 }
 0x12a   : > { %v648_v50 = vpack.c.bf16 %v629_v48, %v628_v47  ;;  %v2293_v51 = vpop.f32.mrb[28].mxu0  ;;  %v3112_v47 = vld [vmem:[%s3543_s4] ss:$0 sm:$0xff] }
 0x12b   : > { %v598_v52 = vadd.f32 %v2293_v51, %v2988_v8  ;;  %v589_v53 = vpop.f32.mrb[29].mxu0  ;;  %v1253_v46 = vsel %vm390_vm1, %v1207_v45, 0.0  ;;  %v1593_v51 = vlaneseq }
 0x12c   : > { %v590_v54 = vadd.f32 %v2988_v8, %v589_v53  ;;  %v2294_v57 = vpop.f32.mrb[30].mxu0  ;;  %2321 = vmatprep.mubr.msk.bf16.mxu1 %vm390_vm1, %v648_v50  ;;  %1245 = vadd.xlane.f32.xlu0 %v1244_v36 }
 0x12d   : > { %v601_v59 = vadd.f32 %v2294_v57, %v2988_v8  ;;  %v592_v60 = vpop.f32.mrb[31].mxu0  ;;  %2322 = vmatmul.mubr.msk.bf16.gmra.mrb[24].mxu1 %vm390_vm1, %v649_v49  ;;  %v634_v62 = vmax.f32 %v598_v52, 0.0 }
 0x12e   : > { %v593_v61 = vadd.f32 %v2988_v8, %v592_v60  ;;  %v632_v2 = vmax.f32 %v590_v54, 0.0  ;;  %v359_v8 = vld [vmem:[%s3544_s5 + $0x48] sm:$0xff] }
 0x12f   : > { %v635_v1 = vmax.f32 %v601_v59, 0.0  ;;  %v1276_v15 = vpack.c.bf16 %v359_v8, %v358_v13  ;;  %v1201_v27 = vmul.f32 %v359_v8, %v359_v8 }
 0x130   : > { %v633_v9 = vmax.f32 %v593_v61, 0.0  ;;  %1251 = vadd.xlane.f32.xlu0 %v1250_v43 }
 0x131   : > { %v651_v10 = vpack.c.bf16 %v635_v1, %v634_v62  ;;  %2462 = vmatprep.subr.msk.bf16.mxu0 %vm390_vm1, %v1276_v15  ;;  %v1341_v56 = vsel %vm390_vm1, %v1276_v15, 0  ;;  %2463 = vmatprep.subr.msk.bf16.mxu1 %vm390_vm1, %v1276_v15  ;;  %v1235_v29 = vsel %vm390_vm1, %v1201_v27, 0.0  ;;  %v3118_v1 = vand.u32 127, %v1593_v51 }
 0x132   : > { %v650_v11 = vpack.c.bf16 %v633_v9, %v632_v2  ;;  %2338 = vmatpush3.bf16.xpose.msra.mxu0 %v1341_v56  ;;  %2448 = vmatpush3.bf16.xpose.msra.mxu1 %v1341_v56 }
 0x133   : > { %2464 = vmatprep.subr.msk.bf16.mxu0 %vm390_vm1, %v1277_v22  ;;  %2465 = vmatprep.subr.msk.bf16.mxu1 %vm390_vm1, %v1277_v22  ;;  %v1606_v13 = vadd.s32 4294967280, %v3118_v1  ;;  %v1599_v15 = vadd.s32 4294967288, %v3118_v1 }
 0x134   : > { %2325 = vmatprep.mubr.msk.bf16.mxu1 %vm390_vm1, %v650_v11  ;;  %1236 = vadd.xlane.f32.xlu1 %v1235_v29 }
 0x135   : > { %2326 = vmatmul.mubr.msk.bf16.gmra.mrb[28].mxu1 %vm390_vm1, %v651_v10  ;;  %v3120_v10 = vshrl.u32 %v1593_v51, 7 }
 0x137   : > { %v1597_v55 = vsub.s32 %v3118_v1, %v3120_v10  ;;  %v1609_v58 = vsub.s32 %v1606_v13, %v3120_v10  ;;  %v1602_v21 = vsub.s32 %v1599_v15, %v3120_v10 }
 0x138   : > { %1242 = vadd.xlane.f32.xlu1 %v1241_v34 }
 0x139   : > { %v1598_v24 = vrot.slane %v1210_v17, %v1597_v55 }
 0x13a   : > { %2340 = vmatpush3.bf16.xpose.msra.mxu0 %v1344_v23  ;;  %2449 = vmatpush3.bf16.xpose.msra.mxu1 %v1344_v23 }
 0x13b   : > { %2466 = vmatprep.subr.msk.bf16.mxu0 %vm390_vm1, %v1278_v30  ;;  %2467 = vmatprep.subr.msk.bf16.mxu1 %vm390_vm1, %v1278_v30 }
 0x13c   : > { %1248 = vadd.xlane.f32.xlu1 %v1247_v40 }
 0x140   : > { %1254 = vadd.xlane.f32.xlu1 %v1253_v46 }
 0x142   : > { %2342 = vmatpush3.bf16.xpose.msra.mxu0 %v1347_v32  ;;  %2450 = vmatpush3.bf16.xpose.msra.mxu1 %v1347_v32 }
 0x143   : > { %2468 = vmatprep.subr.msk.bf16.mxu0 %vm390_vm1, %v1279_v41  ;;  %2469 = vmatprep.subr.msk.bf16.mxu1 %vm390_vm1, %v1279_v41 }
 0x14a   : > { %2344 = vmatpush3.bf16.xpose.msra.mxu0 %v1350_v44  ;;  %2451 = vmatpush3.bf16.xpose.msra.mxu1 %v1350_v44 }
 0x1a3   : > { %v1216_v25 = vpop.xlane.xlu1 %1215 }
 0x1a4   : > { %v1610_v4 = vrot.slane %v1216_v25, %v1609_v58 }
 0x1a5   : > { %v1213_v29 = vpop.xlane.xlu0 %1212 }
 0x1a6   : > { %v1603_v33 = vrot.slane %v1213_v29, %v1602_v21 }
 0x1a8   : > { %v1605_v40 = vsel %vm1604_vm2, %v1603_v33, %v1598_v24  ;;  %vm1704_vm2 = vcmask 1041409  }
 0x1a9   : > { %v3138_v42 = vsel %vm1611_vm3, %v1610_v4, %v1605_v40  ;;  %vm1705_vm3 = vcmask 1042434  }
 0x1d0   : > { %v2299_v48 = vpop.f32.mrb[0].mxu1 }
 0x1d1   : > { %v754_v49 = vadd.f32 %v2299_v48, %v3112_v47  ;;  %v745_v50 = vpop.f32.mrb[1].mxu1 }
 0x1d2   : > { %v746_v52 = vadd.f32 %v3112_v47, %v745_v50  ;;  %v2300_v53 = vpop.f32.mrb[2].mxu1 }
 0x1d3   : > { %v2133_v54 = vmul.f32 -1.442695, %v754_v49  ;;  %v757_v57 = vadd.f32 %v2300_v53, %v3112_v47  ;;  %v748_v59 = vpop.f32.mrb[3].mxu1 }
 0x1d4   : > { %v2131_v60 = vmul.f32 -1.442695, %v746_v52  ;;  %v749_v61 = vadd.f32 %v3112_v47, %v748_v59 }
 0x1d5   : > { %2517 = vpow2.f32 %v2133_v54  ;;  %v2134_v62 = vmul.f32 -1.442695, %v757_v57 }
 0x1d6   : > { %2519 = vpow2.f32 %v2131_v60  ;;  %v2132_v2 = vmul.f32 -1.442695, %v749_v61 }
 0x1d7   : > { %2521 = vpow2.f32 %v2134_v62 }
 0x1d8   : > { %2523 = vpow2.f32 %v2132_v2  ;;  %v2303_v9 = vpop.f32.mrb[4].mxu1 }
 0x1d9   : > { %v770_v11 = vadd.f32 %v2303_v9, %v3112_v47  ;;  %v761_v12 = vpop.f32.mrb[5].mxu1 }
 0x1da   : > { %v762_v8 = vadd.f32 %v3112_v47, %v761_v12  ;;  %v2304_v14 = vpop.f32.mrb[6].mxu1 }
 0x1db   : > { %v2137_v16 = vmul.f32 -1.442695, %v770_v11  ;;  %v773_v5 = vadd.f32 %v2304_v14, %v3112_v47  ;;  %v764_v56 = vpop.f32.mrb[7].mxu1 }
 0x1dc   : > { %v2135_v6 = vmul.f32 -1.442695, %v762_v8  ;;  %v765_v18 = vadd.f32 %v3112_v47, %v764_v56 }
 0x1dd   : > { %2525 = vpow2.f32 %v2137_v16  ;;  %v2138_v19 = vmul.f32 -1.442695, %v773_v5 }
 0x1de   : > { %2527 = vpow2.f32 %v2135_v6  ;;  %v2136_v20 = vmul.f32 -1.442695, %v765_v18 }
 0x1df   : > { %v2518_v22 = vpop.eup %2517  ;;  %2529 = vpow2.f32 %v2138_v19 }
 0x1e0   : > { %v2520_v63 = vpop.eup %2519  ;;  %v970_v0 = vadd.f32 1.0, %v2518_v22  ;;  %2531 = vpow2.f32 %v2136_v20  ;;  %v2307_v23 = vpop.f32.mrb[8].mxu1 }
 0x1e1   : > { %v2522_v26 = vpop.eup %2521  ;;  %v968_v3 = vadd.f32 1.0, %v2520_v63  ;;  %v786_v27 = vadd.f32 %v2307_v23, %v3112_v47  ;;  %v777_v28 = vpop.f32.mrb[9].mxu1 }
 0x1e2   : > { %v2524_v30 = vpop.eup %2523  ;;  %2533 = vrcp.f32 %v970_v0  ;;  %v971_v7 = vadd.f32 1.0, %v2522_v26  ;;  %v778_v31 = vadd.f32 %v3112_v47, %v777_v28  ;;  %v2308_v32 = vpop.f32.mrb[10].mxu1 }
 0x1e3   : > { %2535 = vrcp.f32 %v968_v3  ;;  %v969_v34 = vadd.f32 1.0, %v2524_v30  ;;  %v2141_v35 = vmul.f32 -1.442695, %v786_v27  ;;  %v789_v36 = vadd.f32 %v2308_v32, %v3112_v47  ;;  %v780_v37 = vpop.f32.mrb[11].mxu1 }
 0x1e4   : > { %2537 = vrcp.f32 %v971_v7  ;;  %v2139_v38 = vmul.f32 -1.442695, %v778_v31  ;;  %v781_v39 = vadd.f32 %v3112_v47, %v780_v37 }
 0x1e5   : > { %2539 = vrcp.f32 %v969_v34  ;;  %v2142_v41 = vmul.f32 -1.442695, %v789_v36 }
 0x1e6   : > { %2541 = vpow2.f32 %v2141_v35  ;;  %v2140_v43 = vmul.f32 -1.442695, %v781_v39 }
 0x1e7   : > { %v2526_v44 = vpop.eup %2525  ;;  %2543 = vpow2.f32 %v2139_v38 }
 0x1e8   : > { %v2528_v45 = vpop.eup %2527  ;;  %v974_v46 = vadd.f32 1.0, %v2526_v44  ;;  %2545 = vpow2.f32 %v2142_v41  ;;  %v2311_v48 = vpop.f32.mrb[12].mxu1 }
 0x1e9   : > { %v2530_v49 = vpop.eup %2529  ;;  %v972_v50 = vadd.f32 1.0, %v2528_v45  ;;  %2547 = vpow2.f32 %v2140_v43  ;;  %v802_v51 = vadd.f32 %v2311_v48, %v3112_v47  ;;  %v793_v52 = vpop.f32.mrb[13].mxu1 }
 0x1ea   : > { %v2532_v53 = vpop.eup %2531  ;;  %2549 = vrcp.f32 %v974_v46  ;;  %v975_v54 = vadd.f32 1.0, %v2530_v49  ;;  %v794_v57 = vadd.f32 %v3112_v47, %v793_v52  ;;  %v2312_v59 = vpop.f32.mrb[14].mxu1 }
 0x1eb   : > { %2551 = vrcp.f32 %v972_v50  ;;  %v973_v60 = vadd.f32 1.0, %v2532_v53  ;;  %v2145_v61 = vmul.f32 -1.442695, %v802_v51  ;;  %v805_v62 = vadd.f32 %v2312_v59, %v3112_v47  ;;  %v796_v2 = vpop.f32.mrb[15].mxu1 }
 0x1ec   : > { %v2534_v9 = vpop.eup %2533  ;;  %2553 = vrcp.f32 %v975_v54  ;;  %v2143_v11 = vmul.f32 -1.442695, %v794_v57  ;;  %v797_v12 = vadd.f32 %v3112_v47, %v796_v2 }
 0x1ed   : > { %v2536_v13 = vpop.eup %2535  ;;  %2555 = vrcp.f32 %v973_v60  ;;  %v2146_v8 = vmul.f32 -1.442695, %v805_v62  ;;  %v1066_v14 = vmul.f32 %v2534_v9, %v2534_v9 }
 0x1ee   : > { %v2538_v15 = vpop.eup %2537  ;;  %2557 = vpow2.f32 %v2145_v61  ;;  %v2144_v16 = vmul.f32 -1.442695, %v797_v12  ;;  %v1064_v5 = vmul.f32 %v2536_v13, %v2536_v13 }
 0x1ef   : > { %v2540_v56 = vpop.eup %2539  ;;  %v1257_v17 = vpack.c.bf16 %v2538_v15, %v2534_v9  ;;  %2559 = vpow2.f32 %v2143_v11  ;;  %v1102_v6 = vsel %vm390_vm1, %v1066_v14, 0.0  ;;  %v1067_v18 = vmul.f32 %v2538_v15, %v2538_v15 }
 0x1f0   : > { %v2542_v55 = vpop.eup %2541  ;;  %2561 = vpow2.f32 %v2146_v8  ;;  %1103 = vadd.xlane.f32.xlu0 %v1102_v6  ;;  %v2315_v19 = vpop.f32.mrb[16].mxu1  ;;  %v1256_v58 = vpack.c.bf16 %v2540_v56, %v2536_v13  ;;  %v1065_v20 = vmul.f32 %v2540_v56, %v2540_v56  ;;  %v1096_v27 = vsel %vm390_vm1, %v1064_v5, 0.0 }
 0x1f1   : > { %v2544_v21 = vpop.eup %2543  ;;  %v978_v22 = vadd.f32 1.0, %v2542_v55  ;;  %2563 = vpow2.f32 %v2144_v16  ;;  %v818_v63 = vadd.f32 %v2315_v19, %v3112_v47  ;;  %v809_v0 = vpop.f32.mrb[17].mxu1  ;;  %v1105_v23 = vsel %vm390_vm1, %v1067_v18, 0.0 }
 0x1f2   : > { %v2546_v24 = vpop.eup %2545  ;;  %v976_v25 = vadd.f32 1.0, %v2544_v21  ;;  %v810_v26 = vadd.f32 %v3112_v47, %v809_v0  ;;  %1106 = vadd.xlane.f32.xlu1 %v1105_v23  ;;  %v2316_v3 = vpop.f32.mrb[18].mxu1  ;;  %2345 = vmatprep.mubr.msk.bf16.mxu0 %vm390_vm1, %v1256_v58  ;;  %v1099_v37 = vsel %vm390_vm1, %v1065_v20, 0.0 }
 0x1f3   : > { %v2548_v28 = vpop.eup %2547  ;;  %2565 = vrcp.f32 %v978_v22  ;;  %v979_v4 = vadd.f32 1.0, %v2546_v24  ;;  %v2149_v29 = vmul.f32 -1.442695, %v818_v63  ;;  %v821_v30 = vadd.f32 %v2316_v3, %v3112_v47  ;;  %v812_v7 = vpop.f32.mrb[19].mxu1  ;;  %2346 = vmatmul.mubr.msk.bf16.vlgmr.msra.gmra.mrb[32].mxu0 %vm390_vm1, %v1257_v17 }
 0x1f4   : > { %v2550_v31 = vpop.eup %2549  ;;  %2567 = vrcp.f32 %v976_v25  ;;  %v977_v32 = vadd.f32 1.0, %v2548_v28  ;;  %v2147_v33 = vmul.f32 -1.442695, %v810_v26  ;;  %v813_v34 = vadd.f32 %v3112_v47, %v812_v7  ;;  %1097 = vadd.xlane.f32.xlu0 %v1096_v27 }
 0x1f5   : > { %v2552_v35 = vpop.eup %2551  ;;  %2569 = vrcp.f32 %v979_v4  ;;  %v2150_v36 = vmul.f32 -1.442695, %v821_v30  ;;  %v1070_v38 = vmul.f32 %v2550_v31, %v2550_v31 }
 0x1f6   : > { %v3154_v39 = vpop.eup %2553  ;;  %2571 = vrcp.f32 %v977_v32  ;;  %v2148_v40 = vmul.f32 -1.442695, %v813_v34  ;;  %1100 = vadd.xlane.f32.xlu1 %v1099_v37  ;;  %v1068_v48 = vmul.f32 %v2552_v35, %v2552_v35 }
 0x1f7   : > { %v2556_v41 = vpop.eup %2555  ;;  %2573 = vpow2.f32 %v2149_v29  ;;  %v1259_v43 = vpack.c.bf16 %v3154_v39, %v2550_v31  ;;  %v1114_v53 = vsel %vm390_vm1, %v1070_v38, 0.0 }
 0x1f8   : > { %v2558_v44 = vpop.eup %2557  ;;  %2575 = vpow2.f32 %v2147_v33  ;;  %v2319_v45 = vpop.f32.mrb[20].mxu1  ;;  %v1258_v46 = vpack.c.bf16 %v2556_v41, %v2552_v35  ;;  %v1069_v61 = vmul.f32 %v2556_v41, %v2556_v41  ;;  %v1108_v5 = vsel %vm390_vm1, %v1068_v48, 0.0 }
 0x1f9   : > { %v2560_v49 = vpop.eup %2559  ;;  %v982_v50 = vadd.f32 1.0, %v2558_v44  ;;  %2577 = vpow2.f32 %v2150_v36  ;;  %v834_v51 = vadd.f32 %v2319_v45, %v3112_v47  ;;  %v825_v52 = vpop.f32.mrb[21].mxu1 }
 0x1fa   : > { %v2562_v54 = vpop.eup %2561  ;;  %v980_v57 = vadd.f32 1.0, %v2560_v49  ;;  %2579 = vpow2.f32 %v2148_v40  ;;  %v826_v59 = vadd.f32 %v3112_v47, %v825_v52  ;;  %v2320_v60 = vpop.f32.mrb[22].mxu1  ;;  %1115 = vadd.xlane.f32.xlu1 %v1114_v53  ;;  %2349 = vmatprep.mubr.msk.bf16.mxu0 %vm390_vm1, %v1258_v46  ;;  %v1111_v20 = vsel %vm390_vm1, %v1069_v61, 0.0 }
 0x1fb   : > { %v2564_v62 = vpop.eup %2563  ;;  %2581 = vrcp.f32 %v982_v50  ;;  %v983_v2 = vadd.f32 1.0, %v2562_v54  ;;  %v2153_v9 = vmul.f32 -1.442695, %v834_v51  ;;  %v837_v11 = vadd.f32 %v2320_v60, %v3112_v47  ;;  %v828_v12 = vpop.f32.mrb[23].mxu1  ;;  %2350 = vmatmul.mubr.msk.bf16.gmra.mrb[36].mxu0 %vm390_vm1, %v1259_v43 }
 0x1fc   : > { %2583 = vrcp.f32 %v980_v57  ;;  %v981_v13 = vadd.f32 1.0, %v2564_v62  ;;  %v2151_v8 = vmul.f32 -1.442695, %v826_v59  ;;  %v829_v14 = vadd.f32 %v3112_v47, %v828_v12 }
 0x1fd   : > { %v2566_v15 = vpop.eup %2565  ;;  %2585 = vrcp.f32 %v983_v2  ;;  %v2154_v16 = vmul.f32 -1.442695, %v837_v11 }
 0x1fe   : > { %v2568_v56 = vpop.eup %2567  ;;  %2587 = vrcp.f32 %v981_v13  ;;  %v2152_v17 = vmul.f32 -1.442695, %v829_v14  ;;  %1109 = vadd.xlane.f32.xlu1 %v1108_v5  ;;  %v1074_v55 = vmul.f32 %v2566_v15, %v2566_v15 }
 0x1ff   : > { %v2570_v6 = vpop.eup %2569  ;;  %2589 = vpow2.f32 %v2153_v9  ;;  %v1072_v18 = vmul.f32 %v2568_v56, %v2568_v56 }
 0x200   : > { %v2572_v19 = vpop.eup %2571  ;;  %2591 = vpow2.f32 %v2151_v8  ;;  %v2323_v58 = vpop.f32.mrb[24].mxu1  ;;  %v1261_v21 = vpack.c.bf16 %v2570_v6, %v2566_v15  ;;  %v1075_v22 = vmul.f32 %v2570_v6, %v2570_v6  ;;  %v1126_v32 = vsel %vm390_vm1, %v1074_v55, 0.0 }
 0x201   : > { %v2574_v63 = vpop.eup %2573  ;;  %2593 = vpow2.f32 %v2154_v16  ;;  %v850_v0 = vadd.f32 %v2323_v58, %v3112_v47  ;;  %v841_v23 = vpop.f32.mrb[25].mxu1  ;;  %v1120_v24 = vsel %vm390_vm1, %v1072_v18, 0.0  ;;  %v1260_v25 = vpack.c.bf16 %v2572_v19, %v2568_v56 }
 0x202   : > { %v2576_v26 = vpop.eup %2575  ;;  %v986_v3 = vadd.f32 1.0, %v2574_v63  ;;  %2595 = vpow2.f32 %v2152_v17  ;;  %v842_v27 = vadd.f32 %v3112_v47, %v841_v23  ;;  %1121 = vadd.xlane.f32.xlu0 %v1120_v24  ;;  %v2324_v28 = vpop.f32.mrb[26].mxu1  ;;  %1112 = vadd.xlane.f32.xlu1 %v1111_v20  ;;  %v1129_v31 = vsel %vm390_vm1, %v1075_v22, 0.0 }
 0x203   : > { %v2578_v4 = vpop.eup %2577  ;;  %v984_v29 = vadd.f32 1.0, %v2576_v26  ;;  %v853_v30 = vadd.f32 %v2324_v28, %v3112_v47  ;;  %2353 = vmatprep.mubr.msk.bf16.mxu0 %vm390_vm1, %v1260_v25  ;;  %v844_v7 = vpop.f32.mrb[27].mxu1  ;;  %v2157_v35 = vmul.f32 -1.442695, %v850_v0  ;;  %v1073_v41 = vmul.f32 %v2572_v19, %v2572_v19 }
 0x204   : > { %v2580_v33 = vpop.eup %2579  ;;  %2597 = vrcp.f32 %v986_v3  ;;  %v987_v34 = vadd.f32 1.0, %v2578_v4  ;;  %v845_v36 = vadd.f32 %v3112_v47, %v844_v7  ;;  %2354 = vmatmul.mubr.msk.bf16.gmra.mrb[40].mxu0 %vm390_vm1, %v1261_v21  ;;  %v2155_v40 = vmul.f32 -1.442695, %v842_v27 }
 0x205   : > { %v2582_v37 = vpop.eup %2581  ;;  %2599 = vrcp.f32 %v984_v29  ;;  %v985_v38 = vadd.f32 1.0, %v2580_v33  ;;  %v2158_v44 = vmul.f32 -1.442695, %v853_v30  ;;  %v1123_v60 = vsel %vm390_vm1, %v1073_v41, 0.0 }
 0x206   : > { %v2584_v43 = vpop.eup %2583  ;;  %2601 = vrcp.f32 %v987_v34  ;;  %1130 = vadd.xlane.f32.xlu0 %v1129_v31  ;;  %1127 = vadd.xlane.f32.xlu1 %v1126_v32  ;;  %v1078_v45 = vmul.f32 %v2582_v37, %v2582_v37  ;;  %v2156_v48 = vmul.f32 -1.442695, %v845_v36 }
 0x207   : > { %v3175_v46 = vpop.eup %2585  ;;  %2603 = vrcp.f32 %v985_v38  ;;  %v1076_v49 = vmul.f32 %v2584_v43, %v2584_v43 }
 0x208   : > { %v2588_v50 = vpop.eup %2587  ;;  %2605 = vpow2.f32 %v2157_v35  ;;  %v2327_v51 = vpop.f32.mrb[28].mxu1  ;;  %v1138_v52 = vsel %vm390_vm1, %v1078_v45, 0.0  ;;  %v1263_v53 = vpack.c.bf16 %v3175_v46, %v2582_v37 }
 0x209   : > { %v2590_v54 = vpop.eup %2589  ;;  %2607 = vpow2.f32 %v2155_v40  ;;  %v866_v57 = vadd.f32 %v2327_v51, %v3112_v47  ;;  %v857_v59 = vpop.f32.mrb[29].mxu1  ;;  %v1262_v61 = vpack.c.bf16 %v2588_v50, %v2584_v43  ;;  %v1132_v15 = vsel %vm390_vm1, %v1076_v49, 0.0 }
 0x20a   : > { %v2592_v62 = vpop.eup %2591  ;;  %v990_v2 = vadd.f32 1.0, %v2590_v54  ;;  %2609 = vpow2.f32 %v2158_v44  ;;  %v858_v9 = vadd.f32 %v3112_v47, %v857_v59  ;;  %1139 = vadd.xlane.f32.xlu0 %v1138_v52  ;;  %v2328_v11 = vpop.f32.mrb[30].mxu1  ;;  %1124 = vadd.xlane.f32.xlu1 %v1123_v60  ;;  %v1077_v55 = vmul.f32 %v2588_v50, %v2588_v50 }
 0x20b   : > { %v2594_v12 = vpop.eup %2593  ;;  %v988_v13 = vadd.f32 1.0, %v2592_v62  ;;  %2611 = vpow2.f32 %v2156_v48  ;;  %v869_v8 = vadd.f32 %v2328_v11, %v3112_v47  ;;  %2357 = vmatprep.mubr.msk.bf16.mxu0 %vm390_vm1, %v1262_v61  ;;  %v860_v14 = vpop.f32.mrb[31].mxu1  ;;  %v2161_v56 = vmul.f32 -1.442695, %v866_v57 }
 0x20c   : > { %v2596_v16 = vpop.eup %2595  ;;  %2613 = vrcp.f32 %v990_v2  ;;  %v991_v5 = vadd.f32 1.0, %v2594_v12  ;;  %v861_v17 = vadd.f32 %v3112_v47, %v860_v14  ;;  %2358 = vmatmul.mubr.msk.bf16.gmra.mrb[44].mxu0 %vm390_vm1, %v1263_v53  ;;  %v2159_v18 = vmul.f32 -1.442695, %v858_v9 }
 0x20d   : > { %2615 = vrcp.f32 %v988_v13  ;;  %v989_v6 = vadd.f32 1.0, %v2596_v16  ;;  %v2162_v58 = vmul.f32 -1.442695, %v869_v8  ;;  %v1135_v47 = vsel %vm390_vm1, %v1077_v55, 0.0 }
 0x20e   : > { %v2598_v19 = vpop.eup %2597  ;;  %2617 = vrcp.f32 %v991_v5  ;;  %1133 = vadd.xlane.f32.xlu0 %v1132_v15  ;;  %v2160_v21 = vmul.f32 -1.442695, %v861_v17  ;;  %v1071_v8 = vmul.f32 %v3154_v39, %v3154_v39 }
 0x20f   : > { %v2600_v20 = vpop.eup %2599  ;;  %2619 = vrcp.f32 %v989_v6  ;;  %v1082_v23 = vmul.f32 %v2598_v19, %v2598_v19 }
 0x210   : > { %v2602_v22 = vpop.eup %2601  ;;  %2621 = vpow2.f32 %v2161_v56  ;;  %v1080_v32 = vmul.f32 %v2600_v20, %v2600_v20  ;;  %v1117_v5 = vsel %vm390_vm1, %v1071_v8, 0.0 }
 0x211   : > { %v2604_v63 = vpop.eup %2603  ;;  %v1265_v0 = vpack.c.bf16 %v2602_v22, %v2598_v19  ;;  %2623 = vpow2.f32 %v2159_v18  ;;  %v1150_v31 = vsel %vm390_vm1, %v1082_v23, 0.0  ;;  %v1083_v41 = vmul.f32 %v2602_v22, %v2602_v22 }
 0x212   : > { %v2606_v24 = vpop.eup %2605  ;;  %2625 = vpow2.f32 %v2162_v58  ;;  %1136 = vadd.xlane.f32.xlu0 %v1135_v47  ;;  %v1264_v25 = vpack.c.bf16 %v2604_v63, %v2600_v20  ;;  %v1081_v26 = vmul.f32 %v2604_v63, %v2604_v63  ;;  %v1144_v38 = vsel %vm390_vm1, %v1080_v32, 0.0  ;;  %v1219_v32 = vpop.xlane.xlu1 %1218 }
 0x213   : > { %v2608_v3 = vpop.eup %2607  ;;  %v994_v27 = vadd.f32 1.0, %v2606_v24  ;;  %2627 = vpow2.f32 %v2160_v21  ;;  %v1153_v53 = vsel %vm390_vm1, %v1083_v41, 0.0 }
 0x214   : > { %v2610_v28 = vpop.eup %2609  ;;  %v992_v4 = vadd.f32 1.0, %v2608_v3  ;;  %2361 = vmatprep.mubr.msk.bf16.mxu1 %vm390_vm1, %v1264_v25  ;;  %v1147_v29 = vsel %vm390_vm1, %v1081_v26, 0.0 }
 0x215   : > { %v2612_v30 = vpop.eup %2611  ;;  %2629 = vrcp.f32 %v994_v27  ;;  %v995_v7 = vadd.f32 1.0, %v2610_v28  ;;  %2362 = vmatmul.mubr.msk.bf16.vlgmr.msra.gmra.mrb[32].mxu1 %vm390_vm1, %v1265_v0  ;;  %1148 = vadd.xlane.f32.xlu1 %v1147_v29  ;;  %v1079_v0 = vmul.f32 %v3175_v46, %v3175_v46 }
 0x216   : > { %v2614_v33 = vpop.eup %2613  ;;  %2631 = vrcp.f32 %v992_v4  ;;  %v993_v34 = vadd.f32 1.0, %v2612_v30  ;;  %1151 = vadd.xlane.f32.xlu0 %v1150_v31 }
 0x217   : > { %v2616_v35 = vpop.eup %2615  ;;  %2633 = vrcp.f32 %v995_v7  ;;  %v1086_v39 = vmul.f32 %v2614_v33, %v2614_v33  ;;  %v1141_v24 = vsel %vm390_vm1, %v1079_v0, 0.0  ;;  %v1222_v7 = vpop.xlane.xlu0 %1221  ;;  %v1875_v0 = vld [vmem:[%s3545_s6 + $0x68] sm:$0xff] }
 0x218   : > { %v3192_v36 = vpop.eup %2617  ;;  %2635 = vrcp.f32 %v993_v34  ;;  %v1084_v54 = vmul.f32 %v2616_v35, %v2616_v35  ;;  %v3227_v34 = vpop.xlane.xlu1 %1224 }
 0x219   : > { %v2620_v37 = vpop.eup %2619  ;;  %v1267_v40 = vpack.c.bf16 %v3192_v36, %v2614_v33  ;;  %v1162_v63 = vsel %vm390_vm1, %v1086_v39, 0.0  ;;  %v1087_v25 = vmul.f32 %v3192_v36, %v3192_v36  ;;  %v1873_v39 = vld [vmem:[%s3545_s6 + $0x58] sm:$0xff] }
 0x21a   : > { %v2622_v43 = vpop.eup %2621  ;;  %1145 = vadd.xlane.f32.xlu0 %v1144_v38  ;;  %v1266_v44 = vpack.c.bf16 %v2620_v37, %v2616_v35  ;;  %v1156_v2 = vsel %vm390_vm1, %v1084_v54, 0.0  ;;  %v1085_v9 = vmul.f32 %v2620_v37, %v2620_v37 }
 0x21b   : > { %v2624_v45 = vpop.eup %2623  ;;  %v998_v48 = vadd.f32 1.0, %v2622_v43  ;;  %v1165_v27 = vsel %vm390_vm1, %v1087_v25, 0.0  ;;  %v3223_v31 = vpop.xlane.xlu0 %1227 }
 0x21c   : > { %v2626_v49 = vpop.eup %2625  ;;  %v996_v50 = vadd.f32 1.0, %v2624_v45  ;;  %2365 = vmatprep.mubr.msk.bf16.mxu1 %vm390_vm1, %v1266_v44  ;;  %v1159_v15 = vsel %vm390_vm1, %v1085_v9, 0.0  ;;  %v3231_v36 = vpop.xlane.xlu1 %1230  ;;  %v1862_v44 = vld [vmem:[%s3545_s6] sm:$0xff]  ;;  %v1863_v45 = vld [vmem:[%s3545_s6 + $0x8] sm:$0xff]  ;;  %v1620_v9 = vadd.s32 4294967264, %v3118_v1 }
 0x21d   : > { %v2628_v51 = vpop.eup %2627  ;;  %2637 = vrcp.f32 %v998_v48  ;;  %v999_v52 = vadd.f32 1.0, %v2626_v49  ;;  %2366 = vmatmul.mubr.msk.bf16.gmra.mrb[36].mxu1 %vm390_vm1, %v1267_v40  ;;  %v2413_v48 = vpack.c.bf16 %v1863_v45, %v1862_v44  ;;  %v2757_v49 = vmov 0.0|0.0  }
 0x21e   : > { %2639 = vrcp.f32 %v996_v50  ;;  %v997_v57 = vadd.f32 1.0, %v2628_v51  ;;  %1154 = vadd.xlane.f32.xlu0 %v1153_v53  ;;  %2412 = vmatprep.subr.bf16.mxu1 %v2757_v49  ;;  %v1864_v51 = vld [vmem:[%s3545_s6 + $0x10] sm:$0xff] }
 0x21f   : > { %v2630_v59 = vpop.eup %2629  ;;  %2641 = vrcp.f32 %v999_v52  ;;  %v3225_v33 = vpop.xlane.xlu0 %1233  ;;  %2414 = vmatpush3.bf16.msra.mxu1 %v2413_v48  ;;  %v1865_v52 = vld [vmem:[%s3545_s6 + $0x18] sm:$0xff] }
 0x220   : > { %v2632_v60 = vpop.eup %2631  ;;  %2643 = vrcp.f32 %v997_v57  ;;  %v1090_v61 = vmul.f32 %v2630_v59, %v2630_v59  ;;  %v3235_v38 = vpop.xlane.xlu1 %1236  ;;  %2415 = vmatprep.subr.bf16.mxu1 %v2757_v49  ;;  %v2416_v53 = vpack.c.bf16 %v1865_v52, %v1864_v51  ;;  %v1866_v57 = vld [vmem:[%s3545_s6 + $0x20] sm:$0xff] }
 0x221   : > { %v2634_v62 = vpop.eup %2633  ;;  %v1088_v16 = vmul.f32 %v2632_v60, %v2632_v60 }
 0x222   : > { %v2636_v11 = vpop.eup %2635  ;;  %v1174_v12 = vsel %vm390_vm1, %v1090_v61, 0.0  ;;  %1157 = vadd.xlane.f32.xlu0 %v1156_v2  ;;  %v1269_v13 = vpack.c.bf16 %v2634_v62, %v2630_v59  ;;  %v1091_v56 = vmul.f32 %v2634_v62, %v2634_v62  ;;  %v1867_v59 = vld [vmem:[%s3545_s6 + $0x28] sm:$0xff] }
 0x223   : > { %1175 = vadd.xlane.f32.xlu1 %v1174_v12  ;;  %v1268_v14 = vpack.c.bf16 %v2636_v11, %v2632_v60  ;;  %v1168_v55 = vsel %vm390_vm1, %v1088_v16, 0.0  ;;  %v1089_v21 = vmul.f32 %v2636_v11, %v2636_v11  ;;  %v3229_v35 = vpop.xlane.xlu0 %1239  ;;  %2417 = vmatpush3.bf16.msra.mxu1 %v2416_v53  ;;  %v1613_v60 = vadd.s32 4294967272, %v3118_v1  ;;  %v1868_v11 = vld [vmem:[%s3545_s6 + $0x30] sm:$0xff]  ;;  %v1869_v12 = vld [vmem:[%s3545_s6 + $0x38] sm:$0xff] }
 0x224   : > { %v1177_v58 = vsel %vm390_vm1, %v1091_v56, 0.0  ;;  %v3239_v41 = vpop.xlane.xlu1 %1242  ;;  %2418 = vmatprep.subr.bf16.mxu1 %v2757_v49  ;;  %v2419_v62 = vpack.c.bf16 %v1867_v59, %v1866_v57  ;;  %v2759_v16 = vmov 0.0  }
 0x225   : > { %2369 = vmatprep.mubr.msk.bf16.mxu1 %vm390_vm1, %v1268_v14  ;;  %v1171_v47 = vsel %vm390_vm1, %v1089_v21, 0.0  ;;  %v1616_v8 = vsub.s32 %v1613_v60, %v3120_v10  ;;  %v2422_v14 = vpack.c.bf16 %v1869_v12, %v1868_v11  ;;  %v1669_v60 = vadd.s32 4294967208, %v3118_v1 }
 0x226   : > { %2370 = vmatmul.mubr.msk.bf16.gmra.mrb[40].mxu1 %vm390_vm1, %v1269_v13  ;;  %1160 = vadd.xlane.f32.xlu0 %v1159_v15  ;;  %v1870_v13 = vld [vmem:[%s3545_s6 + $0x40] sm:$0xff]  ;;  %v1871_v15 = vld [vmem:[%s3545_s6 + $0x48] sm:$0xff]  ;;  %v1676_v12 = vadd.s32 4294967200, %v3118_v1 }
 0x227   : > { %v2638_v17 = vpop.eup %2637  ;;  %1118 = vadd.xlane.f32.xlu1 %v1117_v5  ;;  %v3233_v37 = vpop.xlane.xlu0 %1245  ;;  %2420 = vmatpush3.bf16.msra.mxu1 %v2419_v62  ;;  %v1627_v5 = vadd.s32 4294967256, %v3118_v1 }
 0x228   : > { %v2640_v6 = vpop.eup %2639  ;;  %v1094_v23 = vmul.f32 %v2638_v17, %v2638_v17  ;;  %v3250_v50 = vpop.xlane.xlu1 %1248  ;;  %2421 = vmatprep.subr.bf16.mxu1 %v2757_v49 }
 0x229   : > { %v2642_v18 = vpop.eup %2641  ;;  %v1092_v3 = vmul.f32 %v2640_v6, %v2640_v6 }
 0x22a   : > { %v2644_v19 = vpop.eup %2643  ;;  %1169 = vadd.xlane.f32.xlu0 %v1168_v55  ;;  %v1271_v20 = vpack.c.bf16 %v2642_v18, %v2638_v17  ;;  %v1186_v26 = vsel %vm390_vm1, %v1094_v23, 0.0  ;;  %v1095_v29 = vmul.f32 %v2642_v18, %v2642_v18  ;;  %v2425_v17 = vpack.c.bf16 %v1871_v15, %v1870_v13  ;;  %v1872_v55 = vld [vmem:[%s3545_s6 + $0x50] sm:$0xff] }
 0x22b   : > { %1178 = vadd.xlane.f32.xlu1 %v1177_v58  ;;  %v1270_v22 = vpack.c.bf16 %v2644_v19, %v2640_v6  ;;  %v1180_v46 = vsel %vm390_vm1, %v1092_v3, 0.0  ;;  %v1093_v28 = vmul.f32 %v2644_v19, %v2644_v19  ;;  %v3237_v40 = vpop.xlane.xlu0 %1251  ;;  %2423 = vmatpush3.bf16.msra.mxu1 %v2422_v14  ;;  %v1623_v6 = vsub.s32 %v1620_v9, %v3120_v10 }
 0x22c   : > { %v1189_v30 = vsel %vm390_vm1, %v1095_v29, 0.0  ;;  %v3269_v61 = vpop.xlane.xlu1 %1254  ;;  %2424 = vmatprep.subr.bf16.mxu1 %v2757_v49  ;;  %v1617_v19 = vrot.slane %v1219_v32, %v1616_v8  ;;  %v1634_v58 = vadd.s32 4294967248, %v3118_v1  ;;  %v2428_v21 = vpack.c.bf16 %v1873_v39, %v1872_v55 }
 0x22d   : > { %2373 = vmatprep.mubr.msk.bf16.mxu1 %vm390_vm1, %v1270_v22  ;;  %v1183_v4 = vsel %vm390_vm1, %v1093_v28, 0.0  ;;  %v1624_v22 = vrot.slane %v1222_v7, %v1623_v6  ;;  %v1641_v23 = vadd.s32 4294967240, %v3118_v1  ;;  %v1648_v28 = vadd.s32 4294967232, %v3118_v1 }
 0x22e   : > { %2374 = vmatmul.mubr.msk.bf16.gmra.mrb[44].mxu1 %vm390_vm1, %v1271_v20  ;;  %1163 = vadd.xlane.f32.xlu0 %v1162_v63  ;;  %v1630_v20 = vsub.s32 %v1627_v5, %v3120_v10  ;;  %v1874_v63 = vld [vmem:[%s3545_s6 + $0x60] sm:$0xff]  ;;  %v1637_v25 = vsub.s32 %v1634_v58, %v3120_v10  ;;  %v1655_v32 = vadd.s32 4294967224, %v3118_v1  ;;  %v1672_v13 = vsub.s32 %v1669_v60, %v3120_v10 }
 0x22f   : > { %1172 = vadd.xlane.f32.xlu1 %v1171_v47  ;;  %2409 = vmatprep.mubr.msk.f32.mxu1 %vm2758_vm4, %v2759_v16  ;;  %v1619_v47 = vsel %vm1618_vm5, %v1617_v19, %v3138_v42  ;;  %v1876_v42 = vld [vmem:[%s3545_s6 + $0x70] sm:$0xff]  ;;  %v1644_v29 = vsub.s32 %v1641_v23, %v3120_v10  ;;  %v1651_v45 = vsub.s32 %v1648_v28, %v3120_v10  ;;  %v1683_v14 = vadd.s32 4294967192, %v3118_v1 }
 0x230   : > { %2426 = vmatpush3.bf16.msra.mxu1 %v2425_v17  ;;  %v1631_v3 = vrot.slane %v3227_v34, %v1630_v20  ;;  %v1658_v53 = vsub.s32 %v1655_v32, %v3120_v10  ;;  %v1679_v16 = vsub.s32 %v1676_v12, %v3120_v10  ;;  %v1690_v6 = vadd.s32 4294967184, %v3118_v1 }
 0x231   : > { %2427 = vmatprep.subr.bf16.mxu1 %v2757_v49  ;;  %v1645_v51 = vrot.slane %v3231_v36, %v1644_v29  ;;  %v1652_v57 = vrot.slane %v3225_v33, %v1651_v45  ;;  %v1686_v55 = vsub.s32 %v1683_v14, %v3120_v10  ;;  %v1697_v19 = vadd.s32 4294967176, %v3118_v1 }
 0x232   : > { %1142 = vadd.xlane.f32.xlu0 %v1141_v24  ;;  %v1659_v36 = vrot.slane %v3235_v38, %v1658_v53  ;;  %v1673_v38 = vrot.slane %v3239_v41, %v1672_v13  ;;  %v1693_v20 = vsub.s32 %v1690_v6, %v3120_v10  ;;  %vm1702_vm1 = vcmask 1048512  }
 0x233   : > { %1187 = vadd.xlane.f32.xlu1 %v1186_v26  ;;  %v1687_v41 = vrot.slane %v3250_v50, %v1686_v55  ;;  %vm1707_vm4 = vcmask 1043459  }
 0x234   : > { %2429 = vmatpush3.bf16.msra.mxu1 %v2428_v21 }
 0x235   : > { %2430 = vmatprep.subr.bf16.mxu1 %v2757_v49 }
 0x236   : > { %1166 = vadd.xlane.f32.xlu0 %v1165_v27  ;;  %v2431_v27 = vpack.c.bf16 %v1875_v0, %v1874_v63  ;;  %v1700_v63 = vsub.s32 %v1697_v19, %v3120_v10  ;;  %v1694_v0 = vrot.slane %v3237_v40, %v1693_v20 }
 0x237   : > { %1181 = vadd.xlane.f32.xlu1 %v1180_v46  ;;  %v1626_v46 = vsel %vm1625_vm6, %v1624_v22, %v1619_v47 }
 0x238   : > { %v1633_v7 = vsel %vm1632_vm7, %v1631_v3, %v1626_v46  ;;  %2432 = vmatpush3.bf16.msra.mxu1 %v2431_v27 }
 0x239   : > { %2433 = vmatprep.subr.bf16.mxu1 %v2757_v49 }
 0x23b   : > { %1184 = vadd.xlane.f32.xlu1 %v1183_v4  ;;  %v1877_v4 = vld [vmem:[%s3545_s6 + $0x78] sm:$0xff] }
 0x23c   : > { %v2434_v44 = vpack.c.bf16 %v1877_v4, %v1876_v42 }
 0x23e   : > { %2435 = vmatpush3.bf16.msra.mxu1 %v2434_v44 }
 0x23f   : > { %1190 = vadd.xlane.f32.xlu1 %v1189_v30  ;;  %v1638_v30 = vrot.slane %v3223_v31, %v1637_v25  ;;  %v1662_v31 = vadd.s32 4294967216, %v3118_v1  ;;  %v1701_v1 = vrot.slane %v3269_v61, %v1700_v63 }
 0x241   : > { %v1640_v52 = vsel %vm1639_vm8, %v1638_v30, %v1633_v7  ;;  %v1665_v9 = vsub.s32 %v1662_v31, %v3120_v10 }
 0x242   : > { %v1647_v59 = vsel %vm1646_vm9, %v1645_v51, %v1640_v52 }
 0x243   : > { %v1654_v11 = vsel %vm1653_vm10, %v1652_v57, %v1647_v59  ;;  %v1666_v33 = vrot.slane %v3229_v35, %v1665_v9  ;;  %v1680_v35 = vrot.slane %v3233_v37, %v1679_v16 }
 0x244   : > { %v1661_v8 = vsel %vm1660_vm11, %v1659_v36, %v1654_v11 }
 0x245   : > { %v1668_v17 = vsel %vm1667_vm12, %v1666_v33, %v1661_v8 }
 0x246   : > { %v1675_v39 = vsel %vm1674_vm13, %v1673_v38, %v1668_v17 }
 0x247   : > { %v1682_v22 = vsel %vm1681_vm14, %v1680_v35, %v1675_v39 }
 0x248   : > { %v1689_v47 = vsel %vm1688_vm15, %v1687_v41, %v1682_v22 }
 0x249   : > { %v1696_v3 = vsel %vm1695_vm0, %v1694_v0, %v1689_v47 }
 0x24a   : > { %v3376_v29 = vsel %vm1702_vm1, %v1701_v1, %v1696_v3 }
 0x27d   : > { %v3241_v43 = vpop.xlane.xlu0 %1103 }
 0x27f   : > { %v3289_v56 = vpop.xlane.xlu1 %1106 }
 0x281   : > { %v3259_v54 = vpop.xlane.xlu0 %1097 }
 0x283   : > { %v3312_v24 = vpop.xlane.xlu1 %1100 }
 0x287   : > { %v3329_v34 = vpop.xlane.xlu1 %1115 }
 0x28b   : > { %v3340_v62 = vpop.xlane.xlu1 %1109 }
 0x28f   : > { %v3271_v2 = vpop.xlane.xlu0 %1121  ;;  %v3350_v15 = vpop.xlane.xlu1 %1112 }
 0x293   : > { %v3292_v18 = vpop.xlane.xlu0 %1130  ;;  %v3360_v58 = vpop.xlane.xlu1 %1127 }
 0x297   : > { %v3315_v26 = vpop.xlane.xlu0 %1139  ;;  %v3368_v37 = vpop.xlane.xlu1 %1124 }
 0x29b   : > { %v3332_v48 = vpop.xlane.xlu0 %1133 }
 0x29f   : > { %v3343_v49 = vpop.xlane.xlu0 %1136 }
 0x2a2   : > { %v3373_v50 = vpop.xlane.xlu1 %1148 }
 0x2a3   : > { %v3353_v5 = vpop.xlane.xlu0 %1151 }
 0x2a7   : > { %v3363_v21 = vpop.xlane.xlu0 %1145 }
 0x2ab   : > { %v3370_v23 = vpop.xlane.xlu0 %1154 }
 0x2af   : > { %v3379_v32 = vpop.xlane.xlu0 %1157 }
 0x2b0   : > { %v3383_v45 = vpop.xlane.xlu1 %1175 }
 0x2b3   : > { %v3389_v11 = vpop.xlane.xlu0 %1160 }
 0x2b4   : > { %v1119_v33 = vpop.xlane.xlu1 %1118 }
 0x2b7   : > { %v3398_v22 = vpop.xlane.xlu0 %1169 }
 0x2c6   : > { %v2347_v25 = vpop.f32.mrb[32].mxu0 }
 0x2c7   : > { %v1515_v27 = vmul.f32 2.0, %v2347_v25  ;;  %v1386_v46 = vpop.f32.mrb[33].mxu0 }
 0x2c8   : > { %v1513_v28 = vmul.f32 2.0, %v1386_v46  ;;  %v2348_v42 = vpop.f32.mrb[34].mxu0 }
 0x2c9   : > { %v1547_v10 = vsub.f32 %v3241_v43, %v1515_v27  ;;  %v1516_v40 = vmul.f32 2.0, %v2348_v42  ;;  %v1389_v4 = vpop.f32.mrb[35].mxu0 }
 0x2ca   : > { %v1545_v30 = vsub.f32 %v3259_v54, %v1513_v28  ;;  %v1514_v7 = vmul.f32 2.0, %v1389_v4 }
 0x2cb   : > { %v1720_v61 = vadd.f32 %v3376_v29, %v1547_v10  ;;  %v1548_v44 = vsub.f32 %v3289_v56, %v1516_v40 }
 0x2cc   : > { %v1718_v51 = vadd.f32 %v3376_v29, %v1545_v30  ;;  %v1546_v52 = vsub.f32 %v3312_v24, %v1514_v7 }
 0x2cd   : > { %v1721_v43 = vadd.f32 %v3376_v29, %v1548_v44  ;;  %v1752_v8 = vmax.f32 %v1720_v61, 0.0  ;;  %v3404_v44 = vpop.xlane.xlu0 %1163 }
 0x2ce   : > { %v1719_v31 = vadd.f32 %v3376_v29, %v1546_v52  ;;  %v2351_v53 = vpop.f32.mrb[36].mxu0  ;;  %v1750_v59 = vmax.f32 %v1718_v51, 0.0 }
 0x2cf   : > { %v1519_v57 = vmul.f32 2.0, %v2351_v53  ;;  %v1402_v54 = vpop.f32.mrb[37].mxu0  ;;  %v1753_v6 = vmax.f32 %v1721_v43, 0.0 }
 0x2d0   : > { %v1751_v60 = vmax.f32 %v1719_v31, 0.0  ;;  %v1517_v9 = vmul.f32 2.0, %v1402_v54  ;;  %v2352_v36 = vpop.f32.mrb[38].mxu0 }
 0x2d1   : > { %v1551_v56 = vsub.f32 %v3329_v34, %v1519_v57  ;;  %v1520_v12 = vmul.f32 2.0, %v2352_v36  ;;  %v1405_v13 = vpop.f32.mrb[39].mxu0 }
 0x2d2   : > { %v1782_v24 = vmin.f32 %v1750_v59, %v1751_v60  ;;  %v1549_v14 = vsub.f32 %v3340_v62, %v1517_v9  ;;  %v1518_v16 = vmul.f32 2.0, %v1405_v13 }
 0x2d3   : > { %v1724_v38 = vadd.f32 %v3376_v29, %v1551_v56  ;;  %v1552_v17 = vsub.f32 %v1119_v33, %v1520_v12  ;;  %v1143_v33 = vpop.xlane.xlu0 %1142 }
 0x2d4   : > { %v1783_v55 = vmin.f32 %v1782_v24, %v1752_v8  ;;  %v1722_v35 = vadd.f32 %v3376_v29, %v1549_v14  ;;  %v1550_v39 = vsub.f32 %v3350_v15, %v1518_v16 }
 0x2d5   : > { %v1725_v19 = vadd.f32 %v3376_v29, %v1552_v17  ;;  %v1756_v27 = vmax.f32 %v1724_v38, 0.0 }
 0x2d6   : > { %v1754_v34 = vmax.f32 %v1722_v35, 0.0  ;;  %v1784_v20 = vmin.f32 %v1783_v55, %v1753_v6  ;;  %v1723_v41 = vadd.f32 %v3376_v29, %v1550_v39 }
 0x2d7   : > { %v2355_v63 = vpop.f32.mrb[40].mxu0  ;;  %v1757_v4 = vmax.f32 %v1725_v19, 0.0  ;;  %v3416_v19 = vpop.xlane.xlu1 %1178 }
 0x2d8   : > { %v1785_v62 = vmin.f32 %v1784_v20, %v1754_v34  ;;  %v1755_v0 = vmax.f32 %v1723_v41, 0.0  ;;  %v1523_v47 = vmul.f32 2.0, %v2355_v63  ;;  %v1418_v1 = vpop.f32.mrb[41].mxu0 }
 0x2d9   : > { %v1521_v25 = vmul.f32 2.0, %v1418_v1  ;;  %v2356_v3 = vpop.f32.mrb[42].mxu0 }
 0x2da   : > { %v1786_v46 = vmin.f32 %v1785_v62, %v1755_v0  ;;  %v1555_v28 = vsub.f32 %v3360_v58, %v1523_v47  ;;  %v1524_v15 = vmul.f32 2.0, %v2356_v3  ;;  %v1421_v42 = vpop.f32.mrb[43].mxu0 }
 0x2db   : > { %v1553_v10 = vsub.f32 %v3271_v2, %v1521_v25  ;;  %v1522_v40 = vmul.f32 2.0, %v1421_v42 }
 0x2dc   : > { %v1787_v30 = vmin.f32 %v1786_v46, %v1756_v27  ;;  %v1728_v7 = vadd.f32 %v3376_v29, %v1555_v28  ;;  %v1556_v61 = vsub.f32 %v3292_v18, %v1524_v15 }
 0x2dd   : > { %v1726_v51 = vadd.f32 %v3376_v29, %v1553_v10  ;;  %v1554_v52 = vsub.f32 %v3368_v37, %v1522_v40 }
 0x2de   : > { %v1788_v43 = vmin.f32 %v1787_v30, %v1757_v4  ;;  %v1729_v58 = vadd.f32 %v3376_v29, %v1556_v61  ;;  %v1760_v37 = vmax.f32 %v1728_v7, 0.0  ;;  %v3421_v4 = vpop.xlane.xlu1 %1172 }
 0x2df   : > { %v1727_v31 = vadd.f32 %v3376_v29, %v1554_v52  ;;  %v2359_v53 = vpop.f32.mrb[44].mxu0  ;;  %v1758_v59 = vmax.f32 %v1726_v51, 0.0 }
 0x2e0   : > { %v1789_v2 = vrot.slane %v1788_v43, 4  ;;  %v1527_v57 = vmul.f32 2.0, %v2359_v53  ;;  %v1434_v54 = vpop.f32.mrb[45].mxu0  ;;  %v1761_v6 = vmax.f32 %v1729_v58, 0.0 }
 0x2e1   : > { %v1759_v60 = vmax.f32 %v1727_v31, 0.0  ;;  %v1525_v9 = vmul.f32 2.0, %v1434_v54  ;;  %v2360_v36 = vpop.f32.mrb[46].mxu0 }
 0x2e2   : > { %v1790_v18 = vmin.f32 %v1788_v43, %v1789_v2  ;;  %v1559_v56 = vsub.f32 %v3315_v26, %v1527_v57  ;;  %v1528_v12 = vmul.f32 2.0, %v2360_v36  ;;  %v1437_v13 = vpop.f32.mrb[47].mxu0 }
 0x2e3   : > { %v1795_v8 = vmin.f32 %v1758_v59, %v1759_v60  ;;  %v1557_v24 = vsub.f32 %v3332_v48, %v1525_v9  ;;  %v1526_v14 = vmul.f32 2.0, %v1437_v13  ;;  %v1167_v13 = vpop.xlane.xlu0 %1166 }
 0x2e4   : > { %v1791_v16 = vrot.slane %v1790_v18, 2  ;;  %v1732_v38 = vadd.f32 %v3376_v29, %v1559_v56  ;;  %v1560_v17 = vsub.f32 %v1143_v33, %v1528_v12 }
 0x2e5   : > { %v1796_v55 = vmin.f32 %v1795_v8, %v1760_v37  ;;  %v1730_v35 = vadd.f32 %v3376_v29, %v1557_v24  ;;  %v1558_v39 = vsub.f32 %v3343_v49, %v1526_v14 }
 0x2e6   : > { %v1733_v26 = vadd.f32 %v3376_v29, %v1560_v17  ;;  %v1792_v48 = vmin.f32 %v1790_v18, %v1791_v16  ;;  %v1764_v27 = vmax.f32 %v1732_v38, 0.0  ;;  %v3429_v18 = vpop.xlane.xlu1 %1187 }
 0x2e7   : > { %v1762_v34 = vmax.f32 %v1730_v35, 0.0  ;;  %v1797_v20 = vmin.f32 %v1796_v55, %v1761_v6  ;;  %v1731_v41 = vadd.f32 %v3376_v29, %v1558_v39 }
 0x2e8   : > { %v2363_v63 = vpop.f32.mrb[32].mxu1  ;;  %v1793_v42 = vrot.slane %v1792_v48, 1  ;;  %v1765_v30 = vmax.f32 %v1733_v26, 0.0 }
 0x2e9   : > { %v1798_v62 = vmin.f32 %v1797_v20, %v1762_v34  ;;  %v1763_v0 = vmax.f32 %v1731_v41, 0.0  ;;  %v1531_v47 = vmul.f32 2.0, %v2363_v63  ;;  %v1450_v1 = vpop.f32.mrb[33].mxu1 }
 0x2ea   : > { %v1529_v25 = vmul.f32 2.0, %v1450_v1  ;;  %v2364_v3 = vpop.f32.mrb[34].mxu1 }
 0x2eb   : > { %v1799_v46 = vmin.f32 %v1798_v62, %v1763_v0  ;;  %v1563_v49 = vsub.f32 %v3353_v5, %v1531_v47  ;;  %v1532_v28 = vmul.f32 2.0, %v2364_v3  ;;  %v1453_v15 = vpop.f32.mrb[35].mxu1 }
 0x2ec   : > { %v1561_v10 = vsub.f32 %v3363_v21, %v1529_v25  ;;  %v1530_v40 = vmul.f32 2.0, %v1453_v15  ;;  %v1794_v21 = vmin.f32 %v1792_v48, %v1793_v42  ;;  %v1182_v48 = vpop.xlane.xlu1 %1181 }
 0x2ed   : > { %v1800_v7 = vmin.f32 %v1799_v46, %v1764_v27  ;;  %v1736_v61 = vadd.f32 %v3376_v29, %v1563_v49  ;;  %v1564_v51 = vsub.f32 %v3370_v23, %v1532_v28 }
 0x2ee   : > { %v1734_v52 = vadd.f32 %v3376_v29, %v1561_v10  ;;  %v1562_v43 = vsub.f32 %v3373_v50, %v1530_v40  ;;  %v1834_v17 = vadd.f32 1.0, %v1794_v21  ;;  %v1846_v34 = vadd.f32 0.0001, %v1794_v21 }
 0x2ef   : > { %v1801_v58 = vmin.f32 %v1800_v7, %v1765_v30  ;;  %v1737_v5 = vadd.f32 %v3376_v29, %v1564_v51  ;;  %v1768_v33 = vmax.f32 %v1736_v61, 0.0 }
 0x2f0   : > { %v1735_v31 = vadd.f32 %v3376_v29, %v1562_v43  ;;  %v2367_v53 = vpop.f32.mrb[36].mxu1  ;;  %v1766_v59 = vmax.f32 %v1734_v52, 0.0  ;;  %2645 = vlog2.f32 %v1834_v17 }
 0x2f1   : > { %v1802_v2 = vrot.slane %v1801_v58, 4  ;;  %v1535_v57 = vmul.f32 2.0, %v2367_v53  ;;  %v1466_v54 = vpop.f32.mrb[37].mxu1  ;;  %v1769_v6 = vmax.f32 %v1737_v5, 0.0  ;;  %2647 = vlog2.f32 %v1846_v34  ;;  %v1185_v5 = vpop.xlane.xlu1 %1184 }
 0x2f2   : > { %v1767_v60 = vmax.f32 %v1735_v31, 0.0  ;;  %v1533_v9 = vmul.f32 2.0, %v1466_v54  ;;  %v2368_v36 = vpop.f32.mrb[38].mxu1 }
 0x2f3   : > { %v1803_v23 = vmin.f32 %v1801_v58, %v1802_v2  ;;  %v1567_v56 = vsub.f32 %v3404_v44, %v1535_v57  ;;  %v1536_v50 = vmul.f32 2.0, %v2368_v36  ;;  %v1469_v12 = vpop.f32.mrb[39].mxu1 }
 0x2f4   : > { %v1808_v37 = vmin.f32 %v1766_v59, %v1767_v60  ;;  %v1565_v8 = vsub.f32 %v3379_v32, %v1533_v9  ;;  %v1534_v24 = vmul.f32 2.0, %v1469_v12 }
 0x2f5   : > { %v1804_v14 = vrot.slane %v1803_v23, 2  ;;  %v1740_v16 = vadd.f32 %v3376_v29, %v1567_v56  ;;  %v1568_v38 = vsub.f32 %v1167_v13, %v1536_v50 }
 0x2f6   : > { %v1809_v55 = vmin.f32 %v1808_v37, %v1768_v33  ;;  %v1738_v35 = vadd.f32 %v3376_v29, %v1565_v8  ;;  %v1566_v39 = vsub.f32 %v3389_v11, %v1534_v24  ;;  %v1191_v33 = vpop.xlane.xlu1 %1190 }
 0x2f7   : > { %v1805_v44 = vmin.f32 %v1803_v23, %v1804_v14  ;;  %v1741_v26 = vadd.f32 %v3376_v29, %v1568_v38  ;;  %v1772_v27 = vmax.f32 %v1740_v16, 0.0 }
 0x2f8   : > { %v1770_v20 = vmax.f32 %v1738_v35, 0.0  ;;  %v1810_v41 = vmin.f32 %v1809_v55, %v1769_v6  ;;  %v1739_v32 = vadd.f32 %v3376_v29, %v1566_v39 }
 0x2f9   : > { %v1806_v63 = vrot.slane %v1805_v44, 1  ;;  %v2371_v62 = vpop.f32.mrb[40].mxu1  ;;  %v1773_v49 = vmax.f32 %v1741_v26, 0.0 }
 0x2fa   : > { %v1811_v0 = vmin.f32 %v1810_v41, %v1770_v20  ;;  %v1771_v47 = vmax.f32 %v1739_v32, 0.0  ;;  %v1539_v1 = vmul.f32 2.0, %v2371_v62  ;;  %v1482_v25 = vpop.f32.mrb[41].mxu1  ;;  %v2646_v23 = vpop.eup %2645 }
 0x2fb   : > { %v1807_v3 = vmin.f32 %v1805_v44, %v1806_v63  ;;  %v1537_v11 = vmul.f32 2.0, %v1482_v25  ;;  %v2372_v46 = vpop.f32.mrb[42].mxu1  ;;  %v2648_v13 = vpop.eup %2647  ;;  %v1839_v26 = vmul.f32 0.6931472, %v2646_v23 }
 0x2fc   : > { %v1812_v28 = vmin.f32 %v1811_v0, %v1771_v47  ;;  %v1571_v15 = vsub.f32 %v3383_v45, %v1539_v1  ;;  %v1540_v42 = vmul.f32 2.0, %v2372_v46  ;;  %v1485_v10 = vpop.f32.mrb[43].mxu1 }
 0x2fd   : > { %v1569_v40 = vsub.f32 %v3398_v22, %v1537_v11  ;;  %v1538_v30 = vmul.f32 2.0, %v1485_v10  ;;  %v1835_v7 = vadd.f32 1.0, %v1807_v3  ;;  %v1847_v61 = vadd.f32 0.0001, %v1807_v3 }
 0x2fe   : > { %v1813_v51 = vmin.f32 %v1812_v28, %v1772_v27  ;;  %v1744_v52 = vadd.f32 %v3376_v29, %v1571_v15  ;;  %v1572_v43 = vsub.f32 %v3416_v19, %v1540_v42  ;;  %v1960_v58 = vsel %vm1704_vm2, %v1807_v3, %v1794_v21 }
 0x2ff   : > { %v1742_v31 = vadd.f32 %v3376_v29, %v1569_v40  ;;  %v1570_v53 = vsub.f32 %v3421_v4, %v1538_v30  ;;  %2649 = vlog2.f32 %v1835_v7 }
 0x300   : > { %v1814_v45 = vmin.f32 %v1813_v51, %v1773_v49  ;;  %v1745_v2 = vadd.f32 %v3376_v29, %v1572_v43  ;;  %2651 = vlog2.f32 %v1847_v61  ;;  %v1776_v37 = vmax.f32 %v1744_v52, 0.0 }
 0x301   : > { %v1743_v22 = vadd.f32 %v3376_v29, %v1570_v53  ;;  %v2375_v57 = vpop.f32.mrb[44].mxu1  ;;  %v1774_v9 = vmax.f32 %v1742_v31, 0.0 }
 0x302   : > { %v1815_v54 = vrot.slane %v1814_v45, 4  ;;  %v1543_v59 = vmul.f32 2.0, %v2375_v57  ;;  %v1498_v60 = vpop.f32.mrb[45].mxu1  ;;  %v1777_v6 = vmax.f32 %v1745_v2, 0.0 }
 0x303   : > { %v1775_v19 = vmax.f32 %v1743_v22, 0.0  ;;  %v1541_v36 = vmul.f32 2.0, %v1498_v60  ;;  %v2376_v21 = vpop.f32.mrb[46].mxu1 }
 0x304   : > { %v1816_v56 = vmin.f32 %v1814_v45, %v1815_v54  ;;  %v1575_v50 = vsub.f32 %v3429_v18, %v1543_v59  ;;  %v1544_v4 = vmul.f32 2.0, %v2376_v21  ;;  %v1501_v12 = vpop.f32.mrb[47].mxu1 }
 0x305   : > { %v1821_v8 = vmin.f32 %v1774_v9, %v1775_v19  ;;  %v1573_v24 = vsub.f32 %v1182_v48, %v1541_v36  ;;  %v1542_v14 = vmul.f32 2.0, %v1501_v12  ;;  %v1851_v48 = vmul.f32 0.6931472, %v2648_v13 }
 0x306   : > { %v1817_v16 = vrot.slane %v1816_v56, 2  ;;  %v1748_v38 = vadd.f32 %v3376_v29, %v1575_v50  ;;  %v1576_v17 = vsub.f32 %v1191_v33, %v1544_v4 }
 0x307   : > { %v1822_v55 = vmin.f32 %v1821_v8, %v1776_v37  ;;  %v1746_v35 = vadd.f32 %v3376_v29, %v1573_v24  ;;  %v1574_v39 = vsub.f32 %v1185_v5, %v1542_v14  ;;  %v1858_v46 = vsub.f32 %v1839_v26, %v1851_v48 }
 0x308   : > { %v1818_v44 = vmin.f32 %v1816_v56, %v1817_v16  ;;  %v1749_v18 = vadd.f32 %v3376_v29, %v1576_v17  ;;  %v1780_v27 = vmax.f32 %v1748_v38, 0.0 }
 0x309   : > { %v2650_v34 = vpop.eup %2649  ;;  %v1778_v20 = vmax.f32 %v1746_v35, 0.0  ;;  %v1823_v41 = vmin.f32 %v1822_v55, %v1777_v6  ;;  %v1747_v32 = vadd.f32 %v3376_v29, %v1574_v39 }
 0x30a   : > { %v2652_v63 = vpop.eup %2651  ;;  %v1819_v62 = vrot.slane %v1818_v44, 1  ;;  %v1841_v0 = vmul.f32 0.6931472, %v2650_v34  ;;  %v1781_v10 = vmax.f32 %v1749_v18, 0.0 }
 0x30b   : > { %v1824_v47 = vmin.f32 %v1823_v41, %v1778_v20  ;;  %v1779_v1 = vmax.f32 %v1747_v32, 0.0  ;;  %v1853_v25 = vmul.f32 0.6931472, %v2652_v63 }
 0x30c   : > { %v1820_v3 = vmin.f32 %v1818_v44, %v1819_v62 }
 0x30d   : > { %v1825_v11 = vmin.f32 %v1824_v47, %v1779_v1  ;;  %v1859_v49 = vsub.f32 %v1841_v0, %v1853_v25 }
 0x30e   : > { %v1836_v28 = vadd.f32 1.0, %v1820_v3  ;;  %v1848_v15 = vadd.f32 0.0001, %v1820_v3  ;;  %v1961_v42 = vsel %vm1705_vm3, %v1820_v3, %v1960_v58 }
 0x30f   : > { %v1826_v29 = vmin.f32 %v1825_v11, %v1780_v27  ;;  %v1882_v40 = vsel %vm1704_vm2, %v1859_v49, %v1858_v46 }
 0x310   : > { %2653 = vlog2.f32 %v1836_v28 }
 0x311   : > { %v1827_v30 = vmin.f32 %v1826_v29, %v1781_v10  ;;  %2655 = vlog2.f32 %v1848_v15 }
 0x313   : > { %v1828_v7 = vrot.slane %v1827_v30, 4 }
 0x315   : > { %v1829_v61 = vmin.f32 %v1827_v30, %v1828_v7 }
 0x317   : > { %v1830_v51 = vrot.slane %v1829_v61, 2 }
 0x319   : > { %v1831_v52 = vmin.f32 %v1829_v61, %v1830_v51 }
 0x31a   : > { %v2654_v43 = vpop.eup %2653 }
 0x31b   : > { %v2656_v5 = vpop.eup %2655  ;;  %v1832_v31 = vrot.slane %v1831_v52, 1  ;;  %v1843_v58 = vmul.f32 0.6931472, %v2654_v43 }
 0x31c   : > { %v1855_v53 = vmul.f32 0.6931472, %v2656_v5 }
 0x31d   : > { %v1833_v45 = vmin.f32 %v1831_v52, %v1832_v31 }
 0x31e   : > { %v1860_v2 = vsub.f32 %v1843_v58, %v1855_v53 }
 0x31f   : > { %v1837_v22 = vadd.f32 1.0, %v1833_v45  ;;  %v1849_v57 = vadd.f32 0.0001, %v1833_v45  ;;  %v1962_v54 = vsel %vm1707_vm4, %v1833_v45, %v1961_v42 }
 0x320   : > { %v1883_v59 = vsel %vm1705_vm3, %v1860_v2, %v1882_v40  ;;  %1964 = vst [vmem:[%s309_s18] sm:$0xf] %v1962_v54 }
 0x321   : > { %2657 = vlog2.f32 %v1837_v22 }
 0x322   : > { %2659 = vlog2.f32 %v1849_v57 }
 0x32b   : > { %v2658_v60 = vpop.eup %2657 }
 0x32c   : > { %v2660_v9 = vpop.eup %2659  ;;  %v1845_v19 = vmul.f32 0.6931472, %v2658_v60 }
 0x32d   : > { %v1857_v36 = vmul.f32 0.6931472, %v2660_v9 }
 0x32f   : > { %v1861_v21 = vsub.f32 %v1845_v19, %v1857_v36 }
 0x331   : > { %v1884_v23 = vsel %vm1707_vm4, %v1861_v21, %v1883_v59 }
 0x332   : > { %2410 = vmatmul.mubr.f32.vlgmr.msra.gmra.mrb[48].mxu1 %v1884_v23 }
 0x333   : > { %2674 = shalt.err (!%p2671_p3)
}
 0x334   : > { %s2675_s18 = scalar_lea.hbm %s3469_s22, 64  ;;  %s2679_s26 = scalar_lea.hbm %s3547_s8, 128 }
 0x335   : > { %p2676_p4 = scmp.ne.s32.totalorder %s3469_s22, %s2675_s18  ;;  %p2680_p9 = scmp.lt.u32.totalorder %s3469_s22, %s3547_s8 }
 0x336   : > { %p2681_p10 = scmp.lt.u32.totalorder %s2679_s26, %s2675_s18  ;;  %p2683_p12 = scmp.lt.u32.totalorder %s2675_s18, %s3469_s22 }
 0x337   : > { %p2677_p7 = pnand %p2676_p4, %p2845_p5 }
 0x338   : > { %p2682_p11 = por %p2681_p10, %p2680_p9 }
 0x339   : > { %p2678_p8 = pneg %p2677_p7 }
 0x33a   : > { %p2684_p13 = por %p2683_p12, %p2682_p11 }
 0x33c   : > { %p2685_p0 = pnand %p2684_p13, %p2678_p8 }
 0x33e   : > { %2688 = shalt.err (!%p2685_p0)
}
 0x33f   : > { %2471 = dma.vmem_to_hbm [thread:$0]  (%p2845_p5), %s1999_s23, 64, %s3469_s22, %s1972_s24  }
 0x340   : > { %s302_s25 = scalar_lea.vmem [#allocation2], %s2093_s17  ;;  %s3551_s19 = sshll.u32 %s2828_s9, 6 }
 0x341   : > { %s1985_s12 = sshll.u32 %s302_s25, 4  ;;  %s3498_s18 = scalar_lea.hbm %s3546_s7, %s3551_s19  ;;  %s3491_s12 = int_to_ptr.vmem [resolvable:$true] %s1985_s12 }
 0x342   : > { %s1967_s26 = scalar_lea.sflag [#allocation3], %s3455_s13  ;;  %s2689_s10 = scalar_lea.vmem %s3491_s12, 64 }
 0x343   : > { %p2690_p1 = scmp.ne.s32.totalorder %s3491_s12, %s2689_s10  ;;  %s2761_s17 = smov [#allocation2]  }
 0x344   : > { %s2693_s22 = sshll.u32 %s2761_s17, 4  ;;  %s2694_s22 = int_to_ptr.vmem [resolvable:$false] %s2693_s22 }
 0x345   : > { %p2691_p2 = pnand %p2690_p1, %p2845_p5  ;;  %s2695_s9 = scalar_lea.vmem %s2694_s22, 128 }
 0x346   : > { %p2696_p4 = scmp.lt.s32.totalorder %s3491_s12, %s2694_s22  ;;  %p2697_p7 = scmp.lt.s32.totalorder %s2695_s9, %s2689_s10 }
 0x347   : > { %p2692_p3 = pneg %p2691_p2 }
 0x348   : > { %p2698_p8 = por %p2697_p7, %p2696_p4 }
 0x34a   : > { %p2699_p9 = pnand %p2698_p8, %p2692_p3 }
 0x405   : > { %v1952_v56 = vpop.f32.mrb[48].mxu1 }
 0x406   : > { %1965 = vst [vmem:[%s302_s25] sm:$0xf] %v1952_v56  ;;  %v2411_v50 = vpop.f32.mrb[49].mxu1 }
 0x407   : > { %2702 = shalt.err (!%p2699_p9)
}
 0x408   : > { %s2703_s13 = scalar_lea.hbm %s3498_s18, 64  ;;  %s2707_s25 = scalar_lea.hbm %s3546_s7, 128 }
 0x409   : > { %p2704_p10 = scmp.ne.s32.totalorder %s3498_s18, %s2703_s13  ;;  %p2708_p13 = scmp.lt.u32.totalorder %s3498_s18, %s3546_s7 }
 0x40a   : > { %p2709_p0 = scmp.lt.u32.totalorder %s2707_s25, %s2703_s13  ;;  %p2711_p2 = scmp.lt.u32.totalorder %s2703_s13, %s3498_s18 }
 0x40b   : > { %p2705_p11 = pnand %p2704_p10, %p2845_p5 }
 0x40c   : > { %p2710_p1 = por %p2709_p0, %p2708_p13 }
 0x40d   : > { %p2706_p12 = pneg %p2705_p11 }
 0x40e   : > { %p2712_p3 = por %p2711_p2, %p2710_p1 }
 0x410   : > { %p2713_p4 = pnand %p2712_p3, %p2706_p12 }
 0x412   : > { %2716 = shalt.err (!%p2713_p4)
}
 0x413   : > { %2470 = dma.vmem_to_hbm [thread:$0]  (%p2845_p5), %s3491_s12, 64, %s3498_s18, %s1967_s26  }
 0x414 PF: > { %p2481_p7 = scmp.ge.s32.totalorder %s2755_s30, 2  ;;  %s2010_s21 = sand.u32 1, %s2743_s27  }
 0x415   : > { %s2011_s10 = scalar_lea.sflag [#allocation3], %s2010_s21 }
 0x416   : > { %p2475_p8 = pnand %p2481_p7, %p2849_p6 }
 0x418   : > { %2734 = dma.done.wait (!%p2475_p8), %s2011_s10, 64  }
 0x419   : > { %2736 = vsyncadd (!%p2475_p8), %s2011_s10, 4294967232  ;;  %s2020_s17 = scalar_lea.sflag [#allocation5], %s2010_s21 }
 0x41a   : > { %2738 = dma.done.wait (!%p2475_p8), %s2020_s17, 64  }
 0x41b   : > { %2740 = vsyncadd (!%p2475_p8), %s2020_s17, 4294967232  ;;  %p22_p5 = scmp.ge.s32.totalorder %s2832_s11, 4   ;;  %s3552_s27 = smov %s2747_s28 }
 0x41c   : > { %s3553_s28 = smov %s2751_s29  ;;  %s3554_s29 = smov %s2843_s14 }
 0x41d   : > { %s3555_s30 = smov %s2832_s11  ;;  %24 = sbr.rel (!%p22_p5) target bundleno = 5 (0x5), region = 100 }
 0x424   :  { %2025 = vsyncpa [#allocation3], 1 }
 0x425   :  { %2027 = vsyncpa [#allocation3 + $0x1], 1 }
 0x426   :  { %2028 = vsyncpa [#allocation5], 1 }
 0x427   :  { %2030 = vsyncpa [#allocation5 + $0x1], 1 }

</bundles_post_ra>
